<compile_context>
chip_gen: v7x
topology: tpu7x:2x2x1
jax: 0.10.0
libtpu: 0.0.40
codegen_flags: <defaults>
</compile_context>

<pallas_src>
import functools

import jax
import jax.numpy as jnp
from jax.experimental import pallas as pl
from jax.experimental.pallas import tpu as pltpu

DIM_IN = 512
H1 = 256
H2 = 128
DIM_AUD = 64
NEG_SLOPE = 0.02


def _leaky_relu(x):
    # For 0 < slope < 1, max(x, slope*x) == LeakyReLU(x): one mul + one max.
    return jnp.maximum(x, NEG_SLOPE * x)


def audionet_kernel(x_ref, w1_ref, b1_ref, w2_ref, b2_ref, w3_ref, b3_ref, o_ref):
    # Full 3-layer MLP hot path: bf16 MXU matmuls with f32 accumulation,
    # bias add + LeakyReLU on the VPU in f32. x is cast to bf16 here (not in
    # the wrapper) so it only crosses HBM once.
    x = x_ref[...].astype(jnp.bfloat16)                                   # (tm, 512)
    h1 = jnp.dot(x, w1_ref[...], preferred_element_type=jnp.float32) + b1_ref[...]
    h1 = _leaky_relu(h1).astype(jnp.bfloat16)                             # (tm, 256)
    h2 = jnp.dot(h1, w2_ref[...], preferred_element_type=jnp.float32) + b2_ref[...]
    h2 = _leaky_relu(h2).astype(jnp.bfloat16)                             # (tm, 128)
    out = jnp.dot(h2, w3_ref[...], preferred_element_type=jnp.float32) + b3_ref[...]
    o_ref[...] = out.astype(o_ref.dtype)                                  # (tm, 64)


@functools.partial(jax.jit, static_argnames=("tm",))
def audionet_ave_forward(x, prepared_params, tm=256):
    """x: (T, 1, 512) float32 -> (T, 64) float32 (matches PyTorch forward).

    `prepared_params` must come from `prepare_params` (bf16 weights, f32
    biases), so this forward is a single pallas_call with no extra XLA ops
    besides a free metadata reshape of x.
    """
    w1, b1, w2, b2, w3, b3 = prepared_params
    T = x.shape[0]
    # permute(1,0,2).squeeze(0) on the output is equivalent to working on
    # this (T, feat) slab directly; reshape is layout-preserving (no copy).
    x2d = x.reshape(T, DIM_IN)                      # stays f32

    grid = (pl.cdiv(T, tm),)          # ragged last block handled by Pallas
    full = lambda i: (0, 0)           # weights/biases: resident, not re-DMA'd

    flops = 2 * T * (DIM_IN * H1 + H1 * H2 + H2 * DIM_AUD)
    bytes_accessed = (
        T * DIM_IN * 4 + T * DIM_AUD * 4                       # x in (f32), out (f32)
        + (DIM_IN * H1 + H1 * H2 + H2 * DIM_AUD) * 2           # bf16 weights
        + (H1 + H2 + DIM_AUD) * 4                              # f32 biases
    )

    out = pl.pallas_call(
        audionet_kernel,
        out_shape=jax.ShapeDtypeStruct((T, DIM_AUD), jnp.float32),
        grid_spec=pltpu.PrefetchScalarGridSpec(
            num_scalar_prefetch=0,
            grid=grid,
            in_specs=[
                pl.BlockSpec((tm, DIM_IN), lambda i: (i, 0)),   # x rows (f32)
                pl.BlockSpec((DIM_IN, H1), full),               # W1 (512,256) bf16
                pl.BlockSpec((1, H1), full),                    # b1 f32
                pl.BlockSpec((H1, H2), full),                   # W2 (256,128) bf16
                pl.BlockSpec((1, H2), full),                    # b2 f32
                pl.BlockSpec((H2, DIM_AUD), full),              # W3 (128,64) bf16
                pl.BlockSpec((1, DIM_AUD), full),               # b3 f32
            ],
            # Last dim 64 == full array dim -> legal block; masked stores are
            # cheaper than a separate slice pass at this size.
            out_specs=pl.BlockSpec((tm, DIM_AUD), lambda i: (i, 0)),
        ),
        compiler_params=pltpu.CompilerParams(
            dimension_semantics=("parallel",)),
        cost_estimate=pl.CostEstimate(
            flops=flops, transcendentals=0, bytes_accessed=bytes_accessed),
    )(x2d, w1, b1, w2, b2, w3, b3)

    return out


def init_params(key):
    """Deterministic synthetic f32 weights with nn.Linear-like init.

    PyTorch stores Linear weight as (out, in); we keep the transposed
    (in, out) layout so the kernel does x @ W + b directly.
    """
    k1, k2, k3, k4, k5, k6 = jax.random.split(key, 6)

    def lin(kw, kb, din, dout):
        bound = 1.0 / jnp.sqrt(din)
        w = jax.random.uniform(kw, (din, dout), jnp.float32, -bound, bound)
        b = jax.random.uniform(kb, (1, dout), jnp.float32, -bound, bound)
        return w, b

    w1, b1 = lin(k1, k2, DIM_IN, H1)
    w2, b2 = lin(k3, k4, H1, H2)
    w3, b3 = lin(k5, k6, H2, DIM_AUD)
    return (w1, b1, w2, b2, w3, b3)


def prepare_params(params):
    """One-time, at-model-init conversion: bf16 weights for the MXU, f32
    biases. Done outside the jitted forward so no per-call cast/pad ops."""
    w1, b1, w2, b2, w3, b3 = params
    bf = jnp.bfloat16
    return (w1.astype(bf), b1, w2.astype(bf), b2, w3.astype(bf), b3)


def reference_forward_f32(x, params):
    """Pure-f32 JAX reference mirroring the PyTorch module exactly."""
    w1, b1, w2, b2, w3, b3 = params
    h = x @ w1 + b1
    h = jnp.where(h > 0, h, NEG_SLOPE * h)
    h = h @ w2 + b2
    h = jnp.where(h > 0, h, NEG_SLOPE * h)
    h = h @ w3 + b3
    return jnp.transpose(h, (1, 0, 2))[0]          # permute(1,0,2).squeeze(0)


def reference_forward_bf16(x, params):
    """Reference that mirrors the kernel's bf16-input / f32-accumulate math."""
    w1, b1, w2, b2, w3, b3 = params
    bf = jnp.bfloat16
    h = x.reshape(x.shape[0], DIM_IN).astype(bf)
    h = jnp.dot(h, w1.astype(bf), preferred_element_type=jnp.float32) + b1
    h = jnp.maximum(h, NEG_SLOPE * h).astype(bf)
    h = jnp.dot(h, w2.astype(bf), preferred_element_type=jnp.float32) + b2
    h = jnp.maximum(h, NEG_SLOPE * h).astype(bf)
    h = jnp.dot(h, w3.astype(bf), preferred_element_type=jnp.float32) + b3
    return h


if __name__ == "__main__":
    key = jax.random.PRNGKey(0)
    kp, kx = jax.random.split(key)
    params = init_params(kp)              # f32 "PyTorch" parameters
    kparams = prepare_params(params)      # bf16 weights, done once

    T = 300  # audio windows: 2 grid steps at tm=256 (ragged last block)
    x = jax.random.normal(kx, (T, 1, DIM_IN), jnp.float32)

    out = jax.block_until_ready(audionet_ave_forward(x, kparams))
    assert out.shape == (T, DIM_AUD), out.shape

    # Tight check vs a reference that mirrors the kernel's bf16/f32 math.
    ref_bf16 = reference_forward_bf16(x, params)
    err_bf16 = float(jnp.max(jnp.abs(out - ref_bf16)))
    assert err_bf16 < 2e-3, err_bf16

    # Loose sanity check vs the pure-f32 PyTorch-equivalent reference
    # (difference is only the deliberate bf16 quantization of x / weights).
    ref_f32 = reference_forward_f32(x, params)
    err_f32 = float(jnp.max(jnp.abs(out - ref_f32)))
    assert err_f32 < 0.2, err_f32

    print("KERNEL_OK")
</pallas_src>

<mosaic_0001>
module attributes {stable_mosaic.version = 11 : i64} {
  func.func @audionet_kernel(%arg0: i32, %arg1: memref<256x512xf32, #tpu.memory_space<vmem>>, %arg2: memref<512x256xbf16, #tpu.memory_space<vmem>>, %arg3: memref<1x256xf32, #tpu.memory_space<vmem>>, %arg4: memref<256x128xbf16, #tpu.memory_space<vmem>>, %arg5: memref<1x128xf32, #tpu.memory_space<vmem>>, %arg6: memref<128x64xbf16, #tpu.memory_space<vmem>>, %arg7: memref<1x64xf32, #tpu.memory_space<vmem>>, %arg8: memref<256x64xf32, #tpu.memory_space<vmem>>) attributes {dimension_semantics = [#tpu.dimension_semantics<parallel>], iteration_bounds = array<i64: 2>, scalar_prefetch = 0 : i64, scratch_operands = 0 : i64, tpu.core_type = #tpu.core_type<tc>, window_params = [{transform_indices = @transform_0, window_bounds = array<i64: 256, 512>}, {pipeline_mode = #tpu.pipeline_mode<synchronous>, transform_indices = @transform_1, window_bounds = array<i64: 512, 256>}, {pipeline_mode = #tpu.pipeline_mode<synchronous>, transform_indices = @transform_2, window_bounds = array<i64: 1, 256>}, {pipeline_mode = #tpu.pipeline_mode<synchronous>, transform_indices = @transform_3, window_bounds = array<i64: 256, 128>}, {pipeline_mode = #tpu.pipeline_mode<synchronous>, transform_indices = @transform_4, window_bounds = array<i64: 1, 128>}, {pipeline_mode = #tpu.pipeline_mode<synchronous>, transform_indices = @transform_5, window_bounds = array<i64: 128, 64>}, {pipeline_mode = #tpu.pipeline_mode<synchronous>, transform_indices = @transform_6, window_bounds = array<i64: 1, 64>}, {transform_indices = @transform_7, window_bounds = array<i64: 256, 64>}]} {
    %c0 = arith.constant 0 : index
    %c0_0 = arith.constant 0 : index
    %0 = vector.load %arg1[%c0, %c0_0] : memref<256x512xf32, #tpu.memory_space<vmem>>, vector<256x512xf32>
    %1 = arith.truncf %0 : vector<256x512xf32> to vector<256x512xbf16>
    %c0_1 = arith.constant 0 : index
    %c0_2 = arith.constant 0 : index
    %2 = vector.load %arg2[%c0_1, %c0_2] : memref<512x256xbf16, #tpu.memory_space<vmem>>, vector<512x256xbf16>
    %cst = arith.constant dense<0.000000e+00> : vector<256x256xf32>
    %3 = tpu.matmul %1, %2, %cst {dimension_numbers = #tpu.dot_dimension_numbers<[1], [0], [0], [1], [0, 0, 1, 1], [], []>} : vector<256x512xbf16>, vector<512x256xbf16>, vector<256x256xf32> -> vector<256x256xf32>
    %c0_3 = arith.constant 0 : index
    %c0_4 = arith.constant 0 : index
    %4 = vector.load %arg3[%c0_3, %c0_4] : memref<1x256xf32, #tpu.memory_space<vmem>>, vector<1x256xf32>
    %5 = vector.broadcast %4 : vector<1x256xf32> to vector<256x256xf32>
    %6 = arith.addf %3, %5 : vector<256x256xf32>
    %cst_5 = arith.constant 2.000000e-02 : f32
    %7 = vector.broadcast %cst_5 : f32 to vector<256x256xf32>
    %8 = arith.mulf %7, %6 : vector<256x256xf32>
    %9 = arith.maximumf %6, %8 : vector<256x256xf32>
    %10 = arith.truncf %9 : vector<256x256xf32> to vector<256x256xbf16>
    %c0_6 = arith.constant 0 : index
    %c0_7 = arith.constant 0 : index
    %11 = vector.load %arg4[%c0_6, %c0_7] : memref<256x128xbf16, #tpu.memory_space<vmem>>, vector<256x128xbf16>
    %cst_8 = arith.constant dense<0.000000e+00> : vector<256x128xf32>
    %12 = tpu.matmul %10, %11, %cst_8 {dimension_numbers = #tpu.dot_dimension_numbers<[1], [0], [0], [1], [0, 0, 1, 1], [], []>} : vector<256x256xbf16>, vector<256x128xbf16>, vector<256x128xf32> -> vector<256x128xf32>
    %c0_9 = arith.constant 0 : index
    %c0_10 = arith.constant 0 : index
    %13 = vector.load %arg5[%c0_9, %c0_10] : memref<1x128xf32, #tpu.memory_space<vmem>>, vector<1x128xf32>
    %14 = vector.broadcast %13 : vector<1x128xf32> to vector<256x128xf32>
    %15 = arith.addf %12, %14 : vector<256x128xf32>
    %cst_11 = arith.constant 2.000000e-02 : f32
    %16 = vector.broadcast %cst_11 : f32 to vector<256x128xf32>
    %17 = arith.mulf %16, %15 : vector<256x128xf32>
    %18 = arith.maximumf %15, %17 : vector<256x128xf32>
    %19 = arith.truncf %18 : vector<256x128xf32> to vector<256x128xbf16>
    %c0_12 = arith.constant 0 : index
    %c0_13 = arith.constant 0 : index
    %20 = vector.load %arg6[%c0_12, %c0_13] : memref<128x64xbf16, #tpu.memory_space<vmem>>, vector<128x64xbf16>
    %cst_14 = arith.constant dense<0.000000e+00> : vector<256x64xf32>
    %21 = tpu.matmul %19, %20, %cst_14 {dimension_numbers = #tpu.dot_dimension_numbers<[1], [0], [0], [1], [0, 0, 1, 1], [], []>} : vector<256x128xbf16>, vector<128x64xbf16>, vector<256x64xf32> -> vector<256x64xf32>
    %c0_15 = arith.constant 0 : index
    %c0_16 = arith.constant 0 : index
    %22 = vector.load %arg7[%c0_15, %c0_16] : memref<1x64xf32, #tpu.memory_space<vmem>>, vector<1x64xf32>
    %23 = vector.broadcast %22 : vector<1x64xf32> to vector<256x64xf32>
    %24 = arith.addf %21, %23 : vector<256x64xf32>
    %c0_17 = arith.constant 0 : index
    %c0_18 = arith.constant 0 : index
    %25 = vector.load %arg8[%c0_17, %c0_18] : memref<256x64xf32, #tpu.memory_space<vmem>>, vector<256x64xf32>
    tpu.vector_store %arg8[%c0_17, %c0_18], %24 {strides = array<i32>} : memref<256x64xf32, #tpu.memory_space<vmem>>, vector<256x64xf32>,
    return
  }
  func.func @transform_0(%arg0: i32) -> (i32, i32) {
    %c0_i32 = arith.constant 0 : i32
    %c0_i32_0 = arith.constant 0 : i32
    return %arg0, %c0_i32 : i32, i32
  }
  func.func @transform_1(%arg0: i32) -> (i32, i32) {
    %c0_i32 = arith.constant 0 : i32
    %c0_i32_0 = arith.constant 0 : i32
    %c0_i32_1 = arith.constant 0 : i32
    return %c0_i32, %c0_i32_0 : i32, i32
  }
  func.func @transform_2(%arg0: i32) -> (i32, i32) {
    %c0_i32 = arith.constant 0 : i32
    %c0_i32_0 = arith.constant 0 : i32
    %c0_i32_1 = arith.constant 0 : i32
    return %c0_i32, %c0_i32_0 : i32, i32
  }
  func.func @transform_3(%arg0: i32) -> (i32, i32) {
    %c0_i32 = arith.constant 0 : i32
    %c0_i32_0 = arith.constant 0 : i32
    %c0_i32_1 = arith.constant 0 : i32
    return %c0_i32, %c0_i32_0 : i32, i32
  }
  func.func @transform_4(%arg0: i32) -> (i32, i32) {
    %c0_i32 = arith.constant 0 : i32
    %c0_i32_0 = arith.constant 0 : i32
    %c0_i32_1 = arith.constant 0 : i32
    return %c0_i32, %c0_i32_0 : i32, i32
  }
  func.func @transform_5(%arg0: i32) -> (i32, i32) {
    %c0_i32 = arith.constant 0 : i32
    %c0_i32_0 = arith.constant 0 : i32
    %c0_i32_1 = arith.constant 0 : i32
    return %c0_i32, %c0_i32_0 : i32, i32
  }
  func.func @transform_6(%arg0: i32) -> (i32, i32) {
    %c0_i32 = arith.constant 0 : i32
    %c0_i32_0 = arith.constant 0 : i32
    %c0_i32_1 = arith.constant 0 : i32
    return %c0_i32, %c0_i32_0 : i32, i32
  }
  func.func @transform_7(%arg0: i32) -> (i32, i32) {
    %c0_i32 = arith.constant 0 : i32
    %c0_i32_0 = arith.constant 0 : i32
    return %arg0, %c0_i32 : i32, i32
  }
}

</mosaic_0001>

<bundles_post_ra>
// kernel: audionet_ave_forward.1
= control target key start
LH: loop header
LB: loop body
LE: loop exit
PB: predicated region body
PF: predicated region fallthrough
CT: control target
= control target key end

     0   :  { %s3222_s24 = smov 0   ;;  %s3224_s25 = smov 0   ;;  %s4052_s0 = inlined_call_operand.vmem [shape: f32[300,512], index: 0, kind: input, shape index: {}]   ;;  %s4053_s1 = inlined_call_operand.vmem [shape: bf16[512,256], index: 1, kind: input, shape index: {}]   ;;  %s4054_s2 = inlined_call_operand.vmem [shape: f32[1,256], index: 2, kind: input, shape index: {}]   ;;  %s4055_s3 = inlined_call_operand.vmem [shape: bf16[256,128], index: 3, kind: input, shape index: {}]   ;;  %s4056_s4 = inlined_call_operand.vmem [shape: f32[1,128], index: 4, kind: input, shape index: {}]   ;;  %s4057_s5 = inlined_call_operand.vmem [shape: bf16[128,64], index: 5, kind: input, shape index: {}]   ;;  %s4058_s6 = inlined_call_operand.vmem [shape: f32[1,64], index: 6, kind: input, shape index: {}]   ;;  %s4059_s7 = inlined_call_operand.vmem [shape: f32[300,64], index: 7, kind: output, shape index: {}]  }
   0x1   :  { %s3226_s26 = smov 0  }
   0x2 LB: > { %s3235_s27 = sadd.s32 4294967295, %s3148_s26   ;;  %s3237_s28 = sadd.s32 1, %s3148_s26   ;;  %s3148_s26 = sphi %s3226_s26, %s4068_s26   ;;  %s3144_s25 = sphi %s3224_s25, %s4067_s25   ;;  %s3140_s24 = sphi %s3222_s24, %s4066_s24  }
   0x3   : > { %s173_s29 = ssub.s32 %s3148_s26, %s3237_s28  ;;  %s176_s30 = sadd.s32 1, %s3144_s25 }
   0x4   : > { %p174_p0 = scmp.eq.s32.totalorder %s173_s29, 0  ;;  %p186_p1 = scmp.ne.s32.totalorder %s3144_s25, %s3140_s24 }
   0x5   : > { %p187_p2 = scmp.eq.s32.totalorder %s3235_s27, 1  ;;  %p2426_p3 = scmp.ge.s32.totalorder %s3148_s26, 1 }
   0x6   : > { %s3245_s8 = scalar_select %p174_p0, %s3144_s25, %s176_s30  }
   0x7   : > { %p3247_p4 = por %p187_p2, %p186_p1  ;;  %p249_p5 = scmp.lt.s32.totalorder %s3148_s26, 3 }
   0x9   : > { %p250_p6 = pnand %p2426_p3, %p249_p5 }
   0xa   : > { %v2974_v0 = vld [vmem:[%s4053_s1 + $0x4] ss:$8 sps:$4 sm:$0xff] (!%p250_p6)   ;;  %v2976_v1 = vld [vmem:[%s4053_s1] ss:$8 sps:$4 sm:$0xff] (!%p250_p6)   ;;  %v2977_v2 = vld [vmem:[%s4053_s1 + $0x14] ss:$8 sps:$4 sm:$0xff] (!%p250_p6)  }
   0xb   : > { %253 = sbr.rel (%p250_p6) target bundleno = 1014 (0x3f6), region = 48  ;;  %897 = vmatprep.subr.bf16.mxu0 (!%p250_p6), %v2974_v0  ;;  %2726 = vmatprep.subr.bf16.mxu1 (!%p250_p6), %v2974_v0  ;;  %v2979_v3 = vld [vmem:[%s4053_s1 + $0x10] ss:$8 sps:$4 sm:$0xff] (!%p250_p6)   ;;  %v2980_v4 = vld [vmem:[%s4053_s1 + $0x24] ss:$8 sps:$4 sm:$0xff] (!%p250_p6)   ;;  %s3267_s20 = sshll.u32 (!%p250_p6), %s3235_s27, 5 }
   0xc   : > { %898 = vmatpush1.bf16.msra.mxu0 (!%p250_p6), %v2976_v1  ;;  %2742 = vmatpush1.bf16.msra.mxu1 (!%p250_p6), %v2976_v1  ;;  %v2982_v5 = vld [vmem:[%s4053_s1 + $0x20] ss:$8 sps:$4 sm:$0xff] (!%p250_p6)   ;;  %p292_p7 = scmp.lt.s32.totalorder (!%p250_p6), %s3267_s20, 37  ;;  %v2983_v6 = vld [vmem:[%s4053_s1 + $0x34] ss:$8 sps:$4 sm:$0xff] (!%p250_p6)   ;;  %s283_s11 = sand.u32 (!%p250_p6), 1, %s3140_s24  }
   0xd   : > { %899 = vmatprep.subr.bf16.mxu0 (!%p250_p6), %v2977_v2  ;;  %2727 = vmatprep.subr.bf16.mxu1 (!%p250_p6), %v2977_v2  ;;  %v2985_v7 = vld [vmem:[%s4053_s1 + $0x30] ss:$8 sps:$4 sm:$0xff] (!%p250_p6)   ;;  %v2986_v8 = vld [vmem:[%s4053_s1 + $0x44] ss:$8 sps:$4 sm:$0xff] (!%p250_p6)   ;;  %v2988_v9 = vld [vmem:[%s4053_s1 + $0x40] ss:$8 sps:$4 sm:$0xff] (!%p250_p6)  }
   0xe   : > { %v2989_v10 = vld [vmem:[%s4053_s1 + $0x54] ss:$8 sps:$4 sm:$0xff] (!%p250_p6)   ;;  %v2991_v11 = vld [vmem:[%s4053_s1 + $0x50] ss:$8 sps:$4 sm:$0xff] (!%p250_p6)   ;;  %v2992_v12 = vld [vmem:[%s4053_s1 + $0x64] ss:$8 sps:$4 sm:$0xff] (!%p250_p6)  }
   0xf   : > { %v2994_v16 = vld [vmem:[%s4053_s1 + $0x60] ss:$8 sps:$4 sm:$0xff] (!%p250_p6)   ;;  %v2995_v17 = vld [vmem:[%s4053_s1 + $0x74] ss:$8 sps:$4 sm:$0xff] (!%p250_p6)   ;;  %v2997_v18 = vld [vmem:[%s4053_s1 + $0x70] ss:$8 sps:$4 sm:$0xff] (!%p250_p6)  }
  0x10   : > { %900 = vmatpush1.bf16.msra.mxu0 (!%p250_p6), %v2979_v3  ;;  %2743 = vmatpush1.bf16.msra.mxu1 (!%p250_p6), %v2979_v3  ;;  %v2998_v19 = vld [vmem:[%s4053_s1 + $0x84] ss:$8 sps:$4 sm:$0xff] (!%p250_p6)   ;;  %v3000_v20 = vld [vmem:[%s4053_s1 + $0x80] ss:$8 sps:$4 sm:$0xff] (!%p250_p6)   ;;  %v3001_v21 = vld [vmem:[%s4053_s1 + $0x94] ss:$8 sps:$4 sm:$0xff] (!%p250_p6)  }
  0x11   : > { %901 = vmatprep.subr.bf16.mxu0 (!%p250_p6), %v2980_v4  ;;  %2728 = vmatprep.subr.bf16.mxu1 (!%p250_p6), %v2980_v4  ;;  %v3003_v22 = vld [vmem:[%s4053_s1 + $0x90] ss:$8 sps:$4 sm:$0xff] (!%p250_p6)   ;;  %v3004_v23 = vld [vmem:[%s4053_s1 + $0xa4] ss:$8 sps:$4 sm:$0xff] (!%p250_p6)   ;;  %v3006_v24 = vld [vmem:[%s4053_s1 + $0xa0] ss:$8 sps:$4 sm:$0xff] (!%p250_p6)  }
  0x12   : > { %s293_s10 = scalar_select %p292_p7, %s3267_s20, 37  ;;  %v3007_v25 = vld [vmem:[%s4053_s1 + $0xb4] ss:$8 sps:$4 sm:$0xff]   ;;  %v3009_v26 = vld [vmem:[%s4053_s1 + $0xb0] ss:$8 sps:$4 sm:$0xff]   ;;  %vm2051_vm0 = vcmask 523264  }
  0x13   : > { %v3010_v27 = vld [vmem:[%s4053_s1 + $0xc4] ss:$8 sps:$4 sm:$0xff]   ;;  %v3012_v28 = vld [vmem:[%s4053_s1 + $0xc0] ss:$8 sps:$4 sm:$0xff]   ;;  %v3013_v29 = vld [vmem:[%s4053_s1 + $0xd4] ss:$8 sps:$4 sm:$0xff]  }
  0x14   : > { %902 = vmatpush1.bf16.msra.mxu0 %v2982_v5  ;;  %2744 = vmatpush1.bf16.msra.mxu1 %v2982_v5  ;;  %s2538_s15 = sshll.u32 %s293_s10, 5  ;;  %v3015_v30 = vld [vmem:[%s4053_s1 + $0xd0] ss:$8 sps:$4 sm:$0xff]   ;;  %v3016_v31 = vld [vmem:[%s4053_s1 + $0xe4] ss:$8 sps:$4 sm:$0xff]   ;;  %s2427_s12 = sshll.u32 %s283_s11, 8 }
  0x15   : > { %903 = vmatprep.subr.bf16.mxu0 %v2983_v6  ;;  %2729 = vmatprep.subr.bf16.mxu1 %v2983_v6  ;;  %s3292_s21 = scalar_lea.vmem %s4052_s0, %s2538_s15  ;;  %v3018_v32 = vld [vmem:[%s4053_s1 + $0xe0] ss:$8 sps:$4 sm:$0xff]   ;;  %v3019_v33 = vld [vmem:[%s4053_s1 + $0xf4] ss:$8 sps:$4 sm:$0xff]   ;;  %v3021_v34 = vld [vmem:[%s4053_s1 + $0xf0] ss:$8 sps:$4 sm:$0xff]  }
  0x16   : > { %v310_v13 = vld [vmem:[%s3292_s21 + $0x8] sm:$0xff]  ;;  %v309_v35 = vld [vmem:[%s3292_s21] sm:$0xff]  ;;  %v3027_v43 = vld [vmem:[%s4053_s1 + $0x114] ss:$8 sps:$4 sm:$0xff]   ;;  %s3817_s15 = scalar_lea.vmem [#allocation2], %s2427_s12   ;;  %s2092_s24 = ssub.s32 (%p3247_p4), 38, %s3267_s20 }
  0x17   : > { %v314_v14 = vld [vmem:[%s3292_s21 + $0x28] sm:$0xff]  ;;  %v313_v36 = vld [vmem:[%s3292_s21 + $0x20] sm:$0xff]  ;;  %v3025_v44 = vld [vmem:[%s4053_s1 + $0x110] ss:$8 sps:$4 sm:$0xff]   ;;  %s2539_s16 = sshll.u32 (%p3247_p4), %s3235_s27, 8  ;;  %p2093_p8 = scmp.lt.s32.totalorder (%p3247_p4), %s2092_s24, 32 }
  0x18   : > { %904 = vmatpush1.bf16.msra.mxu0 %v2985_v7  ;;  %2745 = vmatpush1.bf16.msra.mxu1 %v2985_v7  ;;  %v438_v15 = vpack.c.bf16 %v314_v14, %v310_v13  ;;  %v3024_v37 = vld [vmem:[%s4053_s1 + $0x104] ss:$8 sps:$4 sm:$0xff]   ;;  %v437_v40 = vpack.c.bf16 %v313_v36, %v309_v35  ;;  %v3022_v41 = vld [vmem:[%s4053_s1 + $0x100] ss:$8 sps:$4 sm:$0xff]   ;;  %v3033_v52 = vld [vmem:[%s4053_s1 + $0x134] ss:$8 sps:$4 sm:$0xff]   ;;  %s3920_s19 = scalar_lea.vmem (%p3247_p4), %s4059_s7, %s2539_s16  }
  0x19   : > { %905 = vmatprep.subr.bf16.mxu0 %v2986_v8  ;;  %2730 = vmatprep.subr.bf16.mxu1 %v2986_v8  ;;  %v318_v38 = vld [vmem:[%s3292_s21 + $0x48] sm:$0xff]  ;;  %v317_v45 = vld [vmem:[%s3292_s21 + $0x40] sm:$0xff]  ;;  %v3031_v56 = vld [vmem:[%s4053_s1 + $0x130] ss:$8 sps:$4 sm:$0xff]  }
  0x1a   : > { %929 = vmatprep.mubr.bf16.mxu0 %v438_v15  ;;  %v322_v39 = vld [vmem:[%s3292_s21 + $0x68] sm:$0xff]  ;;  %v321_v46 = vld [vmem:[%s3292_s21 + $0x60] sm:$0xff]  ;;  %v3039_v62 = vld [vmem:[%s4053_s1 + $0x154] ss:$8 sps:$4 sm:$0xff]  }
  0x1b   : > { %v442_v42 = vpack.c.bf16 %v322_v39, %v318_v38  ;;  %v3030_v47 = vld [vmem:[%s4053_s1 + $0x124] ss:$8 sps:$4 sm:$0xff]   ;;  %v3028_v50 = vld [vmem:[%s4053_s1 + $0x120] ss:$8 sps:$4 sm:$0xff]   ;;  %v441_v51 = vpack.c.bf16 %v321_v46, %v317_v45  ;;  %v3037_v2 = vld [vmem:[%s4053_s1 + $0x150] ss:$8 sps:$4 sm:$0xff]  }
  0x1c   : > { %906 = vmatpush1.bf16.msra.mxu0 %v2988_v9  ;;  %2746 = vmatpush1.bf16.msra.mxu1 %v2988_v9  ;;  %v326_v48 = vld [vmem:[%s3292_s21 + $0x88] sm:$0xff]  ;;  %v325_v54 = vld [vmem:[%s3292_s21 + $0x80] sm:$0xff]  ;;  %v3045_v9 = vld [vmem:[%s4053_s1 + $0x174] ss:$8 sps:$4 sm:$0xff]  }
  0x1d   : > { %907 = vmatprep.subr.bf16.mxu0 %v2989_v10  ;;  %2731 = vmatprep.subr.bf16.mxu1 %v2989_v10  ;;  %v330_v49 = vld [vmem:[%s3292_s21 + $0xa8] sm:$0xff]  ;;  %v329_v55 = vld [vmem:[%s3292_s21 + $0xa0] sm:$0xff]  ;;  %v3063_v39 = vld [vmem:[%s4053_s1 + $0x1d4] ss:$8 sps:$4 sm:$0xff]  }
  0x1e   : > { %v446_v53 = vpack.c.bf16 %v330_v49, %v326_v48  ;;  %v334_v57 = vld [vmem:[%s3292_s21 + $0xc8] sm:$0xff]  ;;  %v445_v61 = vpack.c.bf16 %v329_v55, %v325_v54  ;;  %v333_v0 = vld [vmem:[%s3292_s21 + $0xc0] sm:$0xff]  ;;  %v3069_v49 = vld [vmem:[%s4053_s1 + $0x1f4] ss:$8 sps:$4 sm:$0xff]  }
  0x1f   : > { %v338_v58 = vld [vmem:[%s3292_s21 + $0xe8] sm:$0xff]  ;;  %v337_v1 = vld [vmem:[%s3292_s21 + $0xe0] sm:$0xff] }
  0x20   : > { %908 = vmatpush1.bf16.msra.mxu0 %v2991_v11  ;;  %2747 = vmatpush1.bf16.msra.mxu1 %v2991_v11  ;;  %v3036_v59 = vld [vmem:[%s4053_s1 + $0x144] ss:$8 sps:$4 sm:$0xff]   ;;  %v3034_v60 = vld [vmem:[%s4053_s1 + $0x140] ss:$8 sps:$4 sm:$0xff]   ;;  %v450_v63 = vpack.c.bf16 %v338_v58, %v334_v57  ;;  %v449_v6 = vpack.c.bf16 %v337_v1, %v333_v0  ;;  %v3067_v57 = vld [vmem:[%s4053_s1 + $0x1f0] ss:$8 sps:$4 sm:$0xff]  }
  0x21   : > { %909 = vmatprep.subr.bf16.mxu0 %v2992_v12  ;;  %2732 = vmatprep.subr.bf16.mxu1 %v2992_v12  ;;  %v342_v3 = vld [vmem:[%s3292_s21 + $0x108] sm:$0xff]  ;;  %v341_v10 = vld [vmem:[%s3292_s21 + $0x100] sm:$0xff]  ;;  %v3043_v12 = vld [vmem:[%s4053_s1 + $0x170] ss:$8 sps:$4 sm:$0xff]  }
  0x22   : > { %v346_v4 = vld [vmem:[%s3292_s21 + $0x128] sm:$0xff]  ;;  %v345_v11 = vld [vmem:[%s3292_s21 + $0x120] sm:$0xff] }
  0x23   : > { %v3042_v5 = vld [vmem:[%s4053_s1 + $0x164] ss:$8 sps:$4 sm:$0xff]   ;;  %v454_v7 = vpack.c.bf16 %v346_v4, %v342_v3  ;;  %v3040_v8 = vld [vmem:[%s4053_s1 + $0x160] ss:$8 sps:$4 sm:$0xff]  }
  0x24   : > { %910 = vmatpush1.bf16.msra.mxu0 %v2994_v16  ;;  %2748 = vmatpush1.bf16.msra.mxu1 %v2994_v16  ;;  %v350_v13 = vld [vmem:[%s3292_s21 + $0x148] sm:$0xff]  ;;  %v453_v16 = vpack.c.bf16 %v345_v11, %v341_v10  ;;  %v409_v54 = vld [vmem:[%s3292_s21 + $0x320] sm:$0xff] }
  0x25   : > { %911 = vmatprep.subr.bf16.mxu0 %v2995_v17  ;;  %2733 = vmatprep.subr.bf16.mxu1 %v2995_v17  ;;  %v354_v14 = vld [vmem:[%s3292_s21 + $0x168] sm:$0xff]  ;;  %v373_v55 = vld [vmem:[%s3292_s21 + $0x200] sm:$0xff] }
  0x26   : > { %v3048_v15 = vld [vmem:[%s4053_s1 + $0x184] ss:$8 sps:$4 sm:$0xff]   ;;  %v458_v17 = vpack.c.bf16 %v354_v14, %v350_v13  ;;  %v3058_v38 = vld [vmem:[%s4053_s1 + $0x1c0] ss:$8 sps:$4 sm:$0xff]  }
  0x27   : > { %v3060_v35 = vld [vmem:[%s4053_s1 + $0x1c4] ss:$8 sps:$4 sm:$0xff]   ;;  %v3064_v48 = vld [vmem:[%s4053_s1 + $0x1e0] ss:$8 sps:$4 sm:$0xff]  }
  0x28   : > { %912 = vmatpush1.bf16.msra.mxu0 %v2997_v18  ;;  %2749 = vmatpush1.bf16.msra.mxu1 %v2997_v18  ;;  %v3046_v18 = vld [vmem:[%s4053_s1 + $0x180] ss:$8 sps:$4 sm:$0xff]   ;;  %v3066_v45 = vld [vmem:[%s4053_s1 + $0x1e4] ss:$8 sps:$4 sm:$0xff]  }
  0x29   : > { %913 = vmatprep.subr.bf16.mxu0 %v2998_v19  ;;  %2734 = vmatprep.subr.bf16.mxu1 %v2998_v19  ;;  %v3051_v19 = vld [vmem:[%s4053_s1 + $0x194] ss:$8 sps:$4 sm:$0xff]   ;;  %v418_v0 = vld [vmem:[%s3292_s21 + $0x368] sm:$0xff]  ;;  %v417_v3 = vld [vmem:[%s3292_s21 + $0x360] sm:$0xff] }
  0x2a   : > { %v381_v4 = vld [vmem:[%s3292_s21 + $0x240] sm:$0xff]  ;;  %v422_v11 = vld [vmem:[%s3292_s21 + $0x388] sm:$0xff] }
  0x2b   : > { %v421_v14 = vld [vmem:[%s3292_s21 + $0x380] sm:$0xff] }
  0x2c   : > { %914 = vmatpush1.bf16.msra.mxu0 %v3000_v20  ;;  %2750 = vmatpush1.bf16.msra.mxu1 %v3000_v20  ;;  %v349_v20 = vld [vmem:[%s3292_s21 + $0x140] sm:$0xff] }
  0x2d   : > { %915 = vmatprep.subr.bf16.mxu0 %v3001_v21  ;;  %2735 = vmatprep.subr.bf16.mxu1 %v3001_v21  ;;  %v353_v21 = vld [vmem:[%s3292_s21 + $0x160] sm:$0xff] }
  0x30   : > { %916 = vmatpush1.bf16.msra.mxu0 %v3003_v22  ;;  %2751 = vmatpush1.bf16.msra.mxu1 %v3003_v22  ;;  %v3049_v22 = vld [vmem:[%s4053_s1 + $0x190] ss:$8 sps:$4 sm:$0xff]  }
  0x31   : > { %917 = vmatprep.subr.bf16.mxu0 %v3004_v23  ;;  %2736 = vmatprep.subr.bf16.mxu1 %v3004_v23  ;;  %v358_v23 = vld [vmem:[%s3292_s21 + $0x188] sm:$0xff] }
  0x34   : > { %918 = vmatpush1.bf16.msra.mxu0 %v3006_v24  ;;  %2752 = vmatpush1.bf16.msra.mxu1 %v3006_v24  ;;  %v362_v24 = vld [vmem:[%s3292_s21 + $0x1a8] sm:$0xff] }
  0x35   : > { %919 = vmatprep.subr.bf16.mxu0 %v3007_v25  ;;  %2737 = vmatprep.subr.bf16.mxu1 %v3007_v25  ;;  %v3054_v25 = vld [vmem:[%s4053_s1 + $0x1a4] ss:$8 sps:$4 sm:$0xff]  }
  0x38   : > { %920 = vmatpush1.bf16.msra.mxu0 %v3009_v26  ;;  %2753 = vmatpush1.bf16.msra.mxu1 %v3009_v26  ;;  %v457_v26 = vpack.c.bf16 %v353_v21, %v349_v20  ;;  %v402_v20 = vld [vmem:[%s3292_s21 + $0x2e8] sm:$0xff] }
  0x39   : > { %921 = vmatprep.subr.bf16.mxu0 %v3010_v27  ;;  %2738 = vmatprep.subr.bf16.mxu1 %v3010_v27  ;;  %v462_v27 = vpack.c.bf16 %v362_v24, %v358_v23  ;;  %v430_v23 = vld [vmem:[%s3292_s21 + $0x3c8] sm:$0xff] }
  0x3a   : > { %v434_v24 = vld [vmem:[%s3292_s21 + $0x3e8] sm:$0xff] }
  0x3c   : > { %922 = vmatpush1.bf16.msra.mxu0 %v3012_v28  ;;  %2754 = vmatpush1.bf16.msra.mxu1 %v3012_v28  ;;  %v3052_v28 = vld [vmem:[%s4053_s1 + $0x1a0] ss:$8 sps:$4 sm:$0xff]  }
  0x3d   : > { %923 = vmatprep.subr.bf16.mxu0 %v3013_v29  ;;  %2739 = vmatprep.subr.bf16.mxu1 %v3013_v29  ;;  %v3057_v29 = vld [vmem:[%s4053_s1 + $0x1b4] ss:$8 sps:$4 sm:$0xff]  }
  0x40   : > { %924 = vmatpush1.bf16.msra.mxu0 %v3015_v30  ;;  %2755 = vmatpush1.bf16.msra.mxu1 %v3015_v30  ;;  %v357_v30 = vld [vmem:[%s3292_s21 + $0x180] sm:$0xff] }
  0x41   : > { %925 = vmatprep.subr.bf16.mxu0 %v3016_v31  ;;  %2740 = vmatprep.subr.bf16.mxu1 %v3016_v31  ;;  %v361_v31 = vld [vmem:[%s3292_s21 + $0x1a0] sm:$0xff] }
  0x42   : > { %v461_v36 = vpack.c.bf16 %v361_v31, %v357_v30  ;;  %v312_v31 = vld [vmem:[%s3292_s21 + $0x18] sm:$0xff] }
  0x44   : > { %926 = vmatpush1.bf16.msra.mxu0 %v3018_v32  ;;  %2756 = vmatpush1.bf16.msra.mxu1 %v3018_v32  ;;  %v3055_v32 = vld [vmem:[%s4053_s1 + $0x1b0] ss:$8 sps:$4 sm:$0xff]  }
  0x45   : > { %927 = vmatprep.subr.bf16.mxu0 %v3019_v33  ;;  %2741 = vmatprep.subr.bf16.mxu1 %v3019_v33  ;;  %v366_v33 = vld [vmem:[%s3292_s21 + $0x1c8] sm:$0xff] }
  0x48   : > { %928 = vmatpush1.bf16.msra.mxu0 %v3021_v34  ;;  %2757 = vmatpush1.bf16.msra.mxu1 %v3021_v34  ;;  %v370_v34 = vld [vmem:[%s3292_s21 + $0x1e8] sm:$0xff] }
  0x49   : > { %1090 = vmatprep.subr.bf16.mxu0 %v3024_v37  ;;  %v466_v37 = vpack.c.bf16 %v370_v34, %v366_v33 }
  0x4b   : > { %930 = vmatmul.mubr.bf16.vlgmr.msra.gmra.mrb[0].mxu0 %v437_v40  ;;  %v365_v40 = vld [vmem:[%s3292_s21 + $0x1c0] sm:$0xff] }
  0x4c   : > { %1091 = vmatpush1.bf16.msra.mxu0 %v3022_v41  ;;  %939 = vmatprep.mubr.bf16.mxu0 %v442_v42  ;;  %v369_v41 = vld [vmem:[%s3292_s21 + $0x1e0] sm:$0xff]  ;;  %v3061_v42 = vld [vmem:[%s4053_s1 + $0x1d0] ss:$8 sps:$4 sm:$0xff]  }
  0x4d   : > { %1092 = vmatprep.subr.bf16.mxu0 %v3027_v43  ;;  %v374_v43 = vld [vmem:[%s3292_s21 + $0x208] sm:$0xff]  ;;  %v465_v46 = vpack.c.bf16 %v369_v41, %v365_v40  ;;  %v320_v40 = vld [vmem:[%s3292_s21 + $0x58] sm:$0xff] }
  0x4e   : > { %v324_v41 = vld [vmem:[%s3292_s21 + $0x78] sm:$0xff] }
  0x50   : > { %1093 = vmatpush1.bf16.msra.mxu0 %v3025_v44  ;;  %v378_v44 = vld [vmem:[%s3292_s21 + $0x228] sm:$0xff] }
  0x51   : > { %1094 = vmatprep.subr.bf16.mxu0 %v3030_v47  ;;  %v470_v47 = vpack.c.bf16 %v378_v44, %v374_v43  ;;  %v3074_v44 = vld [vmem:[%s4055_s3 + $0x50] sm:$0xff]  }
  0x53   : > { %940 = vmatmul.mubr.bf16.gmra.mrb[4].mxu0 %v441_v51  ;;  %v410_v51 = vld [vmem:[%s3292_s21 + $0x328] sm:$0xff] }
  0x54   : > { %1095 = vmatpush1.bf16.msra.mxu0 %v3028_v50  ;;  %949 = vmatprep.mubr.bf16.mxu0 %v446_v53  ;;  %v406_v50 = vld [vmem:[%s3292_s21 + $0x308] sm:$0xff]  ;;  %v405_v53 = vld [vmem:[%s3292_s21 + $0x300] sm:$0xff] }
  0x55   : > { %1096 = vmatprep.subr.bf16.mxu0 %v3033_v52  ;;  %v486_v52 = vpack.c.bf16 %v410_v51, %v406_v50  ;;  %v485_v58 = vpack.c.bf16 %v409_v54, %v405_v53  ;;  %v328_v50 = vld [vmem:[%s3292_s21 + $0x98] sm:$0xff]  ;;  %v3078_v54 = vld [vmem:[%s4055_s3 + $0x60] sm:$0xff]  }
  0x56   : > { %v332_v51 = vld [vmem:[%s3292_s21 + $0xb8] sm:$0xff] }
  0x57   : > { %1049 = vmatprep.mubr.bf16.mxu1 %v486_v52  ;;  %v3077_v52 = vld [vmem:[%s4055_s3 + $0x18] sm:$0xff]  }
  0x58   : > { %1097 = vmatpush1.bf16.msra.mxu0 %v3031_v56  ;;  %v377_v56 = vld [vmem:[%s3292_s21 + $0x220] sm:$0xff]  ;;  %1050 = vmatmul.mubr.bf16.vlgmr.msra.gmra.mrb[0].mxu1 %v485_v58  ;;  %v331_v58 = vld [vmem:[%s3292_s21 + $0xb0] sm:$0xff] }
  0x59   : > { %1098 = vmatprep.subr.bf16.mxu0 %v3036_v59  ;;  %v382_v59 = vld [vmem:[%s3292_s21 + $0x248] sm:$0xff] }
  0x5b   : > { %950 = vmatmul.mubr.bf16.gmra.mrb[8].mxu0 %v445_v61  ;;  %v469_v61 = vpack.c.bf16 %v377_v56, %v373_v55  ;;  %v448_v55 = vpack.c.bf16 %v332_v51, %v328_v50  ;;  %v3079_v56 = vld [vmem:[%s4055_s3 + $0x20] sm:$0xff]   ;;  %v412_v50 = vld [vmem:[%s3292_s21 + $0x338] sm:$0xff]  ;;  %v3080_v51 = vld [vmem:[%s4055_s3 + $0x68] sm:$0xff]  }
  0x5c   : > { %959 = vmatprep.mubr.bf16.mxu0 %v450_v63  ;;  %1099 = vmatpush1.bf16.msra.mxu0 %v3034_v60  ;;  %v386_v60 = vld [vmem:[%s3292_s21 + $0x268] sm:$0xff] }
  0x5d   : > { %1100 = vmatprep.subr.bf16.mxu0 %v3039_v62  ;;  %v474_v62 = vpack.c.bf16 %v386_v60, %v382_v59  ;;  %v414_v63 = vld [vmem:[%s3292_s21 + $0x348] sm:$0xff]  ;;  %v336_v59 = vld [vmem:[%s3292_s21 + $0xd8] sm:$0xff] }
  0x5e   : > { %v490_v1 = vpack.c.bf16 %v418_v0, %v414_v63  ;;  %v340_v60 = vld [vmem:[%s3292_s21 + $0xf8] sm:$0xff]  ;;  %v335_v63 = vld [vmem:[%s3292_s21 + $0xd0] sm:$0xff] }
  0x5f   : > { %v339_v0 = vld [vmem:[%s3292_s21 + $0xf0] sm:$0xff] }
  0x60   : > { %1101 = vmatpush1.bf16.msra.mxu0 %v3037_v2  ;;  %v413_v2 = vld [vmem:[%s3292_s21 + $0x340] sm:$0xff]  ;;  %1059 = vmatprep.mubr.bf16.mxu1 %v490_v1  ;;  %v344_v1 = vld [vmem:[%s3292_s21 + $0x118] sm:$0xff] }
  0x61   : > { %1102 = vmatprep.subr.bf16.mxu0 %v3042_v5  ;;  %v385_v5 = vld [vmem:[%s3292_s21 + $0x260] sm:$0xff] }
  0x63   : > { %960 = vmatmul.mubr.bf16.gmra.mrb[12].mxu0 %v449_v6  ;;  %v489_v6 = vpack.c.bf16 %v417_v3, %v413_v2  ;;  %v348_v2 = vld [vmem:[%s3292_s21 + $0x138] sm:$0xff]  ;;  %v451_v3 = vpack.c.bf16 %v339_v0, %v335_v63 }
  0x64   : > { %969 = vmatprep.mubr.bf16.mxu0 %v454_v7  ;;  %1103 = vmatpush1.bf16.msra.mxu0 %v3040_v8  ;;  %v390_v7 = vld [vmem:[%s3292_s21 + $0x288] sm:$0xff] }
  0x65   : > { %1104 = vmatprep.subr.bf16.mxu0 %v3045_v9  ;;  %v394_v8 = vld [vmem:[%s3292_s21 + $0x2a8] sm:$0xff]  ;;  %1060 = vmatmul.mubr.bf16.gmra.mrb[4].mxu1 %v489_v6  ;;  %v473_v9 = vpack.c.bf16 %v385_v5, %v381_v4  ;;  %v456_v4 = vpack.c.bf16 %v348_v2, %v344_v1  ;;  %v343_v5 = vld [vmem:[%s3292_s21 + $0x110] sm:$0xff] }
  0x66   : > { %v478_v10 = vpack.c.bf16 %v394_v8, %v390_v7  ;;  %v347_v6 = vld [vmem:[%s3292_s21 + $0x130] sm:$0xff]  ;;  %v352_v7 = vld [vmem:[%s3292_s21 + $0x158] sm:$0xff] }
  0x67   : > { %v356_v8 = vld [vmem:[%s3292_s21 + $0x178] sm:$0xff]  ;;  %v415_v1 = vld [vmem:[%s3292_s21 + $0x350] sm:$0xff] }
  0x68   : > { %1105 = vmatpush1.bf16.msra.mxu0 %v3043_v12  ;;  %v426_v12 = vld [vmem:[%s3292_s21 + $0x3a8] sm:$0xff]  ;;  %v419_v2 = vld [vmem:[%s3292_s21 + $0x370] sm:$0xff] }
  0x69   : > { %1106 = vmatprep.subr.bf16.mxu0 %v3048_v15  ;;  %v494_v13 = vpack.c.bf16 %v426_v12, %v422_v11  ;;  %v425_v15 = vld [vmem:[%s3292_s21 + $0x3a0] sm:$0xff]  ;;  %v351_v11 = vld [vmem:[%s3292_s21 + $0x150] sm:$0xff] }
  0x6a   : > { %v355_v12 = vld [vmem:[%s3292_s21 + $0x170] sm:$0xff] }
  0x6b   : > { %970 = vmatmul.mubr.bf16.gmra.mrb[16].mxu0 %v453_v16  ;;  %v389_v16 = vld [vmem:[%s3292_s21 + $0x280] sm:$0xff]  ;;  %1069 = vmatprep.mubr.bf16.mxu1 %v494_v13  ;;  %v360_v13 = vld [vmem:[%s3292_s21 + $0x198] sm:$0xff] }
  0x6c   : > { %979 = vmatprep.mubr.bf16.mxu0 %v458_v17  ;;  %1107 = vmatpush1.bf16.msra.mxu0 %v3046_v18  ;;  %v393_v17 = vld [vmem:[%s3292_s21 + $0x2a0] sm:$0xff]  ;;  %v493_v18 = vpack.c.bf16 %v425_v15, %v421_v14  ;;  %v364_v14 = vld [vmem:[%s3292_s21 + $0x1b8] sm:$0xff]  ;;  %v459_v15 = vpack.c.bf16 %v355_v12, %v351_v11 }
  0x6d   : > { %1108 = vmatprep.subr.bf16.mxu0 %v3051_v19  ;;  %v398_v19 = vld [vmem:[%s3292_s21 + $0x2c8] sm:$0xff]  ;;  %v477_v21 = vpack.c.bf16 %v393_v17, %v389_v16  ;;  %v464_v16 = vpack.c.bf16 %v364_v14, %v360_v13  ;;  %v359_v17 = vld [vmem:[%s3292_s21 + $0x190] sm:$0xff] }
  0x6e   : > { %1070 = vmatmul.mubr.bf16.gmra.mrb[8].mxu1 %v493_v18  ;;  %v363_v18 = vld [vmem:[%s3292_s21 + $0x1b0] sm:$0xff] }
  0x6f   : > { %v431_v13 = vld [vmem:[%s3292_s21 + $0x3d0] sm:$0xff] }
  0x70   : > { %1109 = vmatpush1.bf16.msra.mxu0 %v3049_v22  ;;  %v482_v22 = vpack.c.bf16 %v402_v20, %v398_v19  ;;  %v368_v19 = vld [vmem:[%s3292_s21 + $0x1d8] sm:$0xff]  ;;  %v435_v14 = vld [vmem:[%s3292_s21 + $0x3f0] sm:$0xff] }
  0x71   : > { %1110 = vmatprep.subr.bf16.mxu0 %v3054_v25  ;;  %v498_v25 = vpack.c.bf16 %v434_v24, %v430_v23  ;;  %v372_v20 = vld [vmem:[%s3292_s21 + $0x1f8] sm:$0xff]  ;;  %v367_v23 = vld [vmem:[%s3292_s21 + $0x1d0] sm:$0xff] }
  0x72   : > { %v371_v24 = vld [vmem:[%s3292_s21 + $0x1f0] sm:$0xff] }
  0x73   : > { %980 = vmatmul.mubr.bf16.gmra.mrb[20].mxu0 %v457_v26  ;;  %v429_v26 = vld [vmem:[%s3292_s21 + $0x3c0] sm:$0xff]  ;;  %1079 = vmatprep.mubr.bf16.mxu1 %v498_v25  ;;  %v376_v25 = vld [vmem:[%s3292_s21 + $0x218] sm:$0xff] }
  0x74   : > { %989 = vmatprep.mubr.bf16.mxu0 %v462_v27  ;;  %1111 = vmatpush1.bf16.msra.mxu0 %v3052_v28  ;;  %v433_v27 = vld [vmem:[%s3292_s21 + $0x3e0] sm:$0xff] }
  0x75   : > { %1112 = vmatprep.subr.bf16.mxu0 %v3057_v29  ;;  %v397_v28 = vld [vmem:[%s3292_s21 + $0x2c0] sm:$0xff]  ;;  %v497_v30 = vpack.c.bf16 %v433_v27, %v429_v26  ;;  %v380_v26 = vld [vmem:[%s3292_s21 + $0x238] sm:$0xff]  ;;  %v467_v27 = vpack.c.bf16 %v371_v24, %v367_v23 }
  0x76   : > { %v401_v29 = vld [vmem:[%s3292_s21 + $0x2e0] sm:$0xff] }
  0x77   : > { %1080 = vmatmul.mubr.bf16.gmra.mrb[12].mxu1 %v497_v30  ;;  %v481_v33 = vpack.c.bf16 %v401_v29, %v397_v28  ;;  %v472_v28 = vpack.c.bf16 %v380_v26, %v376_v25  ;;  %v375_v29 = vld [vmem:[%s3292_s21 + $0x210] sm:$0xff] }
  0x78   : > { %1113 = vmatpush1.bf16.msra.mxu0 %v3055_v32  ;;  %v316_v32 = vld [vmem:[%s3292_s21 + $0x38] sm:$0xff]  ;;  %v379_v30 = vld [vmem:[%s3292_s21 + $0x230] sm:$0xff] }
  0x79   : > { %1114 = vmatprep.subr.bf16.mxu0 %v3060_v35  ;;  %v440_v34 = vpack.c.bf16 %v316_v32, %v312_v31  ;;  %v3070_v35 = vld [vmem:[%s4055_s3 + $0x40] sm:$0xff]   ;;  %v384_v31 = vld [vmem:[%s3292_s21 + $0x258] sm:$0xff] }
  0x7a   : > { %2542 = vmatprep.subr.bf16.mxu1 %v3070_v35  ;;  %v388_v32 = vld [vmem:[%s3292_s21 + $0x278] sm:$0xff]  ;;  %v383_v35 = vld [vmem:[%s3292_s21 + $0x250] sm:$0xff] }
  0x7b   : > { %990 = vmatmul.mubr.bf16.gmra.mrb[24].mxu0 %v461_v36  ;;  %v3071_v36 = vld [vmem:[%s4055_s3] sm:$0xff]  }
  0x7c   : > { %999 = vmatprep.mubr.bf16.mxu0 %v466_v37  ;;  %1115 = vmatpush1.bf16.msra.mxu0 %v3058_v38  ;;  %v3072_v37 = vld [vmem:[%s4055_s3 + $0x48] sm:$0xff]   ;;  %v311_v38 = vld [vmem:[%s3292_s21 + $0x10] sm:$0xff] }
  0x7d   : > { %1116 = vmatprep.subr.bf16.mxu0 %v3063_v39  ;;  %v315_v39 = vld [vmem:[%s3292_s21 + $0x30] sm:$0xff]  ;;  %2543 = vmatpush3.bf16.msra.mxu1 %v3071_v36 }
  0x7e   : > { %v439_v43 = vpack.c.bf16 %v315_v39, %v311_v38  ;;  %2544 = vmatprep.subr.bf16.mxu1 %v3072_v37  ;;  %v387_v36 = vld [vmem:[%s3292_s21 + $0x270] sm:$0xff]  ;;  %v392_v37 = vld [vmem:[%s3292_s21 + $0x298] sm:$0xff] }
  0x7f   : > { %v396_v38 = vld [vmem:[%s3292_s21 + $0x2b8] sm:$0xff]  ;;  %v475_v39 = vpack.c.bf16 %v387_v36, %v383_v35  ;;  %v565_v35 = vld [vmem:[%s4054_s2] sm:$0x3] }
  0x80   : > { %1117 = vmatpush1.bf16.msra.mxu0 %v3061_v42  ;;  %v3073_v42 = vld [vmem:[%s4055_s3 + $0x8] sm:$0xff]  }
  0x81   : > { %1118 = vmatprep.subr.bf16.mxu0 %v3066_v45  ;;  %v444_v45 = vpack.c.bf16 %v324_v41, %v320_v40  ;;  %2545 = vmatpush3.bf16.msra.mxu1 %v3073_v42  ;;  %v480_v40 = vpack.c.bf16 %v396_v38, %v392_v37  ;;  %v391_v41 = vld [vmem:[%s3292_s21 + $0x290] sm:$0xff] }
  0x82   : > { %2546 = vmatprep.subr.bf16.mxu1 %v3074_v44  ;;  %v395_v42 = vld [vmem:[%s3292_s21 + $0x2b0] sm:$0xff]  ;;  %v404_v44 = vld [vmem:[%s3292_s21 + $0x2f8] sm:$0xff] }
  0x83   : > { %1000 = vmatmul.mubr.bf16.gmra.mrb[28].mxu0 %v465_v46  ;;  %v3075_v46 = vld [vmem:[%s4055_s3 + $0x10] sm:$0xff]  }
  0x84   : > { %1009 = vmatprep.mubr.bf16.mxu0 %v470_v47  ;;  %1119 = vmatpush1.bf16.msra.mxu0 %v3064_v48  ;;  %v3076_v47 = vld [vmem:[%s4055_s3 + $0x58] sm:$0xff]   ;;  %v319_v48 = vld [vmem:[%s3292_s21 + $0x50] sm:$0xff] }
  0x85   : > { %1120 = vmatprep.subr.bf16.mxu0 %v3069_v49  ;;  %v323_v49 = vld [vmem:[%s3292_s21 + $0x70] sm:$0xff]  ;;  %2547 = vmatpush3.bf16.msra.mxu1 %v3075_v46 }
  0x86   : > { %v443_v53 = vpack.c.bf16 %v323_v49, %v319_v48  ;;  %2548 = vmatprep.subr.bf16.mxu1 %v3076_v47  ;;  %v399_v47 = vld [vmem:[%s3292_s21 + $0x2d0] sm:$0xff]  ;;  %v408_v49 = vld [vmem:[%s3292_s21 + $0x318] sm:$0xff] }
  0x87   : > { %v403_v48 = vld [vmem:[%s3292_s21 + $0x2f0] sm:$0xff] }
  0x88   : > { %1121 = vmatpush1.bf16.msra.mxu0 %v3067_v57  ;;  %v327_v57 = vld [vmem:[%s3292_s21 + $0x90] sm:$0xff] }
  0x89   : > { %2549 = vmatpush3.bf16.msra.mxu1 %v3077_v52  ;;  %v3081_v52 = vld [vmem:[%s4055_s3 + $0x28] sm:$0xff]  }
  0x8a   : > { %2550 = vmatprep.subr.bf16.mxu1 %v3078_v54  ;;  %v488_v54 = vpack.c.bf16 %v412_v50, %v408_v49  ;;  %v3086_v50 = vld [vmem:[%s4057_s5] sm:$0xff]  }
  0x8b   : > { %1010 = vmatmul.mubr.bf16.gmra.mrb[32].mxu0 %v469_v61  ;;  %v447_v61 = vpack.c.bf16 %v331_v58, %v327_v57  ;;  %v407_v57 = vld [vmem:[%s3292_s21 + $0x310] sm:$0xff] }
  0x8c   : > { %1019 = vmatprep.mubr.bf16.mxu0 %v474_v62  ;;  %v452_v62 = vpack.c.bf16 %v340_v60, %v336_v59  ;;  %v411_v58 = vld [vmem:[%s3292_s21 + $0x330] sm:$0xff]  ;;  %v416_v59 = vld [vmem:[%s3292_s21 + $0x358] sm:$0xff] }
  0x8d   : > { %2551 = vmatpush3.bf16.msra.mxu1 %v3079_v56  ;;  %v3083_v56 = vld [vmem:[%s4055_s3 + $0x30] sm:$0xff]   ;;  %v420_v60 = vld [vmem:[%s3292_s21 + $0x378] sm:$0xff]  ;;  %v487_v63 = vpack.c.bf16 %v411_v58, %v407_v57 }
  0x8e   : > { %2552 = vmatprep.subr.bf16.mxu1 %v3080_v51  ;;  %v492_v0 = vpack.c.bf16 %v420_v60, %v416_v59 }
  0x91   : > { %2553 = vmatpush3.bf16.msra.mxu1 %v3081_v52 }
  0x93   : > { %1020 = vmatmul.mubr.bf16.gmra.mrb[36].mxu0 %v473_v9  ;;  %v455_v9 = vpack.c.bf16 %v347_v6, %v343_v5  ;;  %v491_v5 = vpack.c.bf16 %v419_v2, %v415_v1  ;;  %v3087_v2 = vld [vmem:[%s4057_s5 + $0x8] sm:$0xff]  }
  0x94   : > { %1029 = vmatprep.mubr.bf16.mxu0 %v478_v10  ;;  %v460_v10 = vpack.c.bf16 %v356_v8, %v352_v7  ;;  %v423_v7 = vld [vmem:[%s3292_s21 + $0x390] sm:$0xff] }
  0x95   : > { %v427_v8 = vld [vmem:[%s3292_s21 + $0x3b0] sm:$0xff] }
  0x96   : > { %v495_v11 = vpack.c.bf16 %v427_v8, %v423_v7 }
  0x9b   : > { %1030 = vmatmul.mubr.bf16.gmra.mrb[40].mxu0 %v477_v21  ;;  %v463_v21 = vpack.c.bf16 %v363_v18, %v359_v17 }
  0x9c   : > { %1039 = vmatprep.mubr.bf16.mxu0 %v482_v22  ;;  %v468_v22 = vpack.c.bf16 %v372_v20, %v368_v19 }
  0xa3   : > { %1040 = vmatmul.mubr.bf16.gmra.mrb[44].mxu0 %v481_v33  ;;  %v471_v33 = vpack.c.bf16 %v379_v30, %v375_v29 }
  0xa4   : > { %1122 = vmatprep.mubr.bf16.mxu0 %v440_v34  ;;  %v476_v34 = vpack.c.bf16 %v388_v32, %v384_v31 }
  0xab   : > { %1123 = vmatmul.mubr.bf16.vlgmr.msra.gmra.mrb[0].mxu0 %v439_v43  ;;  %v400_v43 = vld [vmem:[%s3292_s21 + $0x2d8] sm:$0xff] }
  0xac   : > { %1132 = vmatprep.mubr.bf16.mxu0 %v444_v45  ;;  %v479_v45 = vpack.c.bf16 %v395_v42, %v391_v41  ;;  %v484_v46 = vpack.c.bf16 %v404_v44, %v400_v43 }
  0xb3   : > { %1133 = vmatmul.mubr.bf16.gmra.mrb[4].mxu0 %v443_v53  ;;  %v483_v53 = vpack.c.bf16 %v403_v48, %v399_v47 }
  0xb4   : > { %1142 = vmatprep.mubr.bf16.mxu0 %v448_v55  ;;  %v3082_v55 = vld [vmem:[%s4055_s3 + $0x70] sm:$0xff]  }
  0xb5   : > { %2554 = vmatprep.subr.bf16.mxu1 %v3082_v55 }
  0xb6   : > { %2555 = vmatpush3.bf16.msra.mxu1 %v3083_v56 }
  0xbb   : > { %1143 = vmatmul.mubr.bf16.gmra.mrb[8].mxu0 %v447_v61  ;;  %v3084_v61 = vld [vmem:[%s4055_s3 + $0x78] sm:$0xff]  }
  0xbc   : > { %1152 = vmatprep.mubr.bf16.mxu0 %v452_v62  ;;  %v3085_v62 = vld [vmem:[%s4055_s3 + $0x38] sm:$0xff]   ;;  %2556 = vmatprep.subr.bf16.mxu1 %v3084_v61 }
  0xbd   : > { %2557 = vmatpush3.bf16.msra.mxu1 %v3085_v62 }
  0xbe   : > { %2678 = vmatprep.subr.bf16.mxu1 %v3086_v50 }
  0xc3   : > { %1153 = vmatmul.mubr.bf16.gmra.mrb[12].mxu0 %v451_v3  ;;  %v424_v3 = vld [vmem:[%s3292_s21 + $0x398] sm:$0xff] }
  0xc4   : > { %1162 = vmatprep.mubr.bf16.mxu0 %v456_v4  ;;  %v428_v4 = vld [vmem:[%s3292_s21 + $0x3b8] sm:$0xff] }
  0xc5   : > { %v496_v6 = vpack.c.bf16 %v428_v4, %v424_v3 }
  0xcb   : > { %1163 = vmatmul.mubr.bf16.gmra.mrb[16].mxu0 %v455_v9  ;;  %v432_v9 = vld [vmem:[%s3292_s21 + $0x3d8] sm:$0xff] }
  0xcc   : > { %1172 = vmatprep.mubr.bf16.mxu0 %v460_v10  ;;  %v436_v10 = vld [vmem:[%s3292_s21 + $0x3f8] sm:$0xff] }
  0xcd   : > { %v500_v12 = vpack.c.bf16 %v436_v10, %v432_v9  ;;  %v3088_v9 = vld [vmem:[%s4057_s5 + $0x10] sm:$0xff]  }
  0xd3   : > { %1173 = vmatmul.mubr.bf16.gmra.mrb[20].mxu0 %v459_v15  ;;  %v499_v15 = vpack.c.bf16 %v435_v14, %v431_v13 }
  0xd4   : > { %1182 = vmatprep.mubr.bf16.mxu0 %v464_v16 }
  0xdb   : > { %1183 = vmatmul.mubr.bf16.gmra.mrb[24].mxu0 %v463_v21 }
  0xdc   : > { %1192 = vmatprep.mubr.bf16.mxu0 %v468_v22 }
  0xe3   : > { %1193 = vmatmul.mubr.bf16.gmra.mrb[28].mxu0 %v467_v27 }
  0xe4   : > { %1202 = vmatprep.mubr.bf16.mxu0 %v472_v28  ;;  %v567_v28 = vlaneseq }
  0xe6   : > { %v568_v31 = vshrl.u32 %v567_v28, 7 }
  0xe8   : > { %v573_v36 = vsub.s32 1, %v568_v31 }
  0xea   : > { %v3666_v38 = vrot.slane %v565_v35, %v573_v36 }
  0xeb   : > { %1203 = vmatmul.mubr.bf16.gmra.mrb[32].mxu0 %v471_v33 }
  0xec   : > { %1212 = vmatprep.mubr.bf16.mxu0 %v476_v34  ;;  %v569_v34 = vsub.s32 0, %v568_v31 }
  0xee   : > { %v3664_v37 = vrot.slane %v565_v35, %v569_v34 }
  0xf3   : > { %1213 = vmatmul.mubr.bf16.gmra.mrb[36].mxu0 %v475_v39 }
  0xf4   : > { %1222 = vmatprep.mubr.bf16.mxu0 %v480_v40 }
  0xfb   : > { %1223 = vmatmul.mubr.bf16.gmra.mrb[40].mxu0 %v479_v45 }
  0xfc   : > { %1232 = vmatprep.mubr.bf16.mxu0 %v484_v46 }
 0x103   : > { %1233 = vmatmul.mubr.bf16.gmra.mrb[44].mxu0 %v483_v53 }
 0x104   : > { %1242 = vmatprep.mubr.bf16.mxu0 %v488_v54 }
 0x10b   : > { %1243 = vmatmul.mubr.bf16.gmra.mrb[48].mxu0 %v487_v63 }
 0x10c   : > { %1252 = vmatprep.mubr.bf16.mxu0 %v492_v0 }
 0x113   : > { %1253 = vmatmul.mubr.bf16.gmra.mrb[52].mxu0 %v491_v5 }
 0x114   : > { %1262 = vmatprep.mubr.bf16.mxu0 %v496_v6 }
 0x11b   : > { %1263 = vmatmul.mubr.bf16.gmra.mrb[56].mxu0 %v495_v11 }
 0x11c   : > { %1272 = vmatprep.mubr.bf16.mxu0 %v500_v12 }
 0x123   : > { %1273 = vmatmul.mubr.bf16.gmra.mrb[60].mxu0 %v499_v15 }
 0x12b   : > { %v3629_v16 = vpop.f32.mrb[0].mxu1 }
 0x12c   : > { %v3631_v17 = vpop.f32.mrb[1].mxu1 }
 0x12d   : > { %v3633_v18 = vpop.f32.mrb[2].mxu1 }
 0x12e   : > { %v3635_v19 = vpop.f32.mrb[3].mxu1 }
 0x138   : > { %v3637_v20 = vpop.f32.mrb[4].mxu1 }
 0x139   : > { %v3639_v21 = vpop.f32.mrb[5].mxu1 }
 0x13a   : > { %v3641_v22 = vpop.f32.mrb[6].mxu1 }
 0x13b   : > { %v3643_v23 = vpop.f32.mrb[7].mxu1 }
 0x141   : > { %v3645_v24 = vpop.f32.mrb[8].mxu1 }
 0x142   : > { %v3647_v25 = vpop.f32.mrb[9].mxu1 }
 0x143   : > { %v3649_v26 = vpop.f32.mrb[10].mxu1 }
 0x144   : > { %v3651_v27 = vpop.f32.mrb[11].mxu1 }
 0x14a   : > { %v3653_v29 = vpop.f32.mrb[12].mxu1 }
 0x14b   : > { %v3655_v30 = vpop.f32.mrb[13].mxu1 }
 0x14c   : > { %v3657_v32 = vpop.f32.mrb[14].mxu1 }
 0x14d   : > { %v3659_v33 = vpop.f32.mrb[15].mxu1 }
 0x17e   : > { %v1124_v39 = vpop.f32.mrb[0].mxu0 }
 0x17f   : > { %v2758_v40 = vadd.f32 %v1124_v39, %v3664_v37  ;;  %v1126_v41 = vpop.f32.mrb[1].mxu0 }
 0x180   : > { %v2759_v42 = vadd.f32 %v1126_v41, %v3666_v38  ;;  %v1128_v43 = vpop.f32.mrb[2].mxu0 }
 0x181   : > { %v1283_v44 = vmul.f32 0.02, %v2758_v40  ;;  %v2760_v45 = vadd.f32 %v1128_v43, %v3664_v37  ;;  %v1130_v46 = vpop.f32.mrb[3].mxu0 }
 0x182   : > { %v1284_v47 = vmul.f32 0.02, %v2759_v42  ;;  %v2761_v48 = vadd.f32 %v1130_v46, %v3666_v38 }
 0x183   : > { %v1285_v49 = vmul.f32 0.02, %v2760_v45  ;;  %v1347_v52 = vmax.f32 %v2758_v40, %v1283_v44  ;;  %v3089_v40 = vld [vmem:[%s4057_s5 + $0x18] sm:$0xff]  }
 0x184   : > { %v1286_v51 = vmul.f32 0.02, %v2761_v48  ;;  %v1348_v54 = vmax.f32 %v2759_v42, %v1284_v47 }
 0x185   : > { %v1349_v53 = vmax.f32 %v2760_v45, %v1285_v49 }
 0x186   : > { %v1350_v55 = vmax.f32 %v2761_v48, %v1286_v51  ;;  %v1134_v56 = vpop.f32.mrb[4].mxu0 }
 0x187   : > { %v1411_v57 = vpack.c.bf16 %v1349_v53, %v1347_v52  ;;  %v2762_v58 = vadd.f32 %v1134_v56, %v3664_v37  ;;  %v1136_v59 = vpop.f32.mrb[5].mxu0 }
 0x188   : > { %v2763_v60 = vadd.f32 %v1136_v59, %v3666_v38  ;;  %v1138_v61 = vpop.f32.mrb[6].mxu0  ;;  %v1412_v62 = vpack.c.bf16 %v1350_v55, %v1348_v54 }
 0x189   : > { %v1287_v63 = vmul.f32 0.02, %v2762_v58  ;;  %v2764_v0 = vadd.f32 %v1138_v61, %v3664_v37  ;;  %v1140_v1 = vpop.f32.mrb[7].mxu0 }
 0x18a   : > { %v1288_v3 = vmul.f32 0.02, %v2763_v60  ;;  %v2765_v4 = vadd.f32 %v1140_v1, %v3666_v38  ;;  %1610 = vmatprep.mubr.bf16.mxu1 %v1412_v62 }
 0x18b   : > { %v1289_v5 = vmul.f32 0.02, %v2764_v0  ;;  %1611 = vmatmul.mubr.bf16.vlgmr.msra.gmra.mrb[16].mxu1 %v1411_v57  ;;  %v1351_v7 = vmax.f32 %v2762_v58, %v1287_v63 }
 0x18c   : > { %v1290_v6 = vmul.f32 0.02, %v2765_v4  ;;  %2679 = vmatpush3.bf16.msra.mxu1 %v3086_v50  ;;  %v1352_v10 = vmax.f32 %v2763_v60, %v1288_v3 }
 0x18d   : > { %v1353_v8 = vmax.f32 %v2764_v0, %v1289_v5  ;;  %2680 = vmatprep.subr.bf16.mxu1 %v3087_v2 }
 0x18e   : > { %v1354_v11 = vmax.f32 %v2765_v4, %v1290_v6  ;;  %v1144_v12 = vpop.f32.mrb[8].mxu0 }
 0x18f   : > { %v2766_v13 = vadd.f32 %v1144_v12, %v3664_v37  ;;  %v1146_v14 = vpop.f32.mrb[9].mxu0  ;;  %v1413_v15 = vpack.c.bf16 %v1353_v8, %v1351_v7 }
 0x190   : > { %v2767_v28 = vadd.f32 %v1146_v14, %v3666_v38  ;;  %v1148_v31 = vpop.f32.mrb[10].mxu0  ;;  %v1414_v34 = vpack.c.bf16 %v1354_v11, %v1352_v10  ;;  %2681 = vmatpush3.bf16.msra.mxu1 %v3087_v2 }
 0x191   : > { %v1291_v35 = vmul.f32 0.02, %v2766_v13  ;;  %v2768_v36 = vadd.f32 %v1148_v31, %v3664_v37  ;;  %v1150_v39 = vpop.f32.mrb[11].mxu0  ;;  %2682 = vmatprep.subr.bf16.mxu1 %v3088_v9 }
 0x192   : > { %v1292_v41 = vmul.f32 0.02, %v2767_v28  ;;  %v2769_v42 = vadd.f32 %v1150_v39, %v3666_v38  ;;  %1618 = vmatprep.mubr.bf16.mxu1 %v1414_v34 }
 0x193   : > { %v1293_v43 = vmul.f32 0.02, %v2768_v36  ;;  %1619 = vmatmul.mubr.bf16.gmra.mrb[20].mxu1 %v1413_v15  ;;  %v1355_v45 = vmax.f32 %v2766_v13, %v1291_v35 }
 0x194   : > { %v1294_v44 = vmul.f32 0.02, %v2769_v42  ;;  %2683 = vmatpush3.bf16.msra.mxu1 %v3088_v9  ;;  %v1356_v47 = vmax.f32 %v2767_v28, %v1292_v41 }
 0x195   : > { %v1357_v46 = vmax.f32 %v2768_v36, %v1293_v43  ;;  %2684 = vmatprep.subr.bf16.mxu1 %v3089_v40 }
 0x196   : > { %v1358_v48 = vmax.f32 %v2769_v42, %v1294_v44  ;;  %v1154_v49 = vpop.f32.mrb[12].mxu0 }
 0x197   : > { %v2770_v50 = vadd.f32 %v1154_v49, %v3664_v37  ;;  %v1156_v51 = vpop.f32.mrb[13].mxu0  ;;  %v1415_v52 = vpack.c.bf16 %v1357_v46, %v1355_v45 }
 0x198   : > { %v2771_v53 = vadd.f32 %v1156_v51, %v3666_v38  ;;  %v1158_v54 = vpop.f32.mrb[14].mxu0  ;;  %v1416_v55 = vpack.c.bf16 %v1358_v48, %v1356_v47  ;;  %2685 = vmatpush3.bf16.msra.mxu1 %v3089_v40 }
 0x199   : > { %v1295_v56 = vmul.f32 0.02, %v2770_v50  ;;  %v2772_v57 = vadd.f32 %v1158_v54, %v3664_v37  ;;  %v1160_v58 = vpop.f32.mrb[15].mxu0 }
 0x19a   : > { %v1296_v59 = vmul.f32 0.02, %v2771_v53  ;;  %v2773_v60 = vadd.f32 %v1160_v58, %v3666_v38  ;;  %1626 = vmatprep.mubr.bf16.mxu1 %v1416_v55 }
 0x19b   : > { %v1297_v61 = vmul.f32 0.02, %v2772_v57  ;;  %1627 = vmatmul.mubr.bf16.gmra.mrb[24].mxu1 %v1415_v52  ;;  %v1359_v63 = vmax.f32 %v2770_v50, %v1295_v56 }
 0x19c   : > { %v1298_v62 = vmul.f32 0.02, %v2773_v60  ;;  %v1360_v1 = vmax.f32 %v2771_v53, %v1296_v59 }
 0x19d   : > { %v1361_v0 = vmax.f32 %v2772_v57, %v1297_v61 }
 0x19e   : > { %v1362_v2 = vmax.f32 %v2773_v60, %v1298_v62  ;;  %v1164_v3 = vpop.f32.mrb[16].mxu0 }
 0x19f   : > { %v2774_v4 = vadd.f32 %v1164_v3, %v3664_v37  ;;  %v1166_v5 = vpop.f32.mrb[17].mxu0  ;;  %v1417_v6 = vpack.c.bf16 %v1361_v0, %v1359_v63 }
 0x1a0   : > { %v2775_v7 = vadd.f32 %v1166_v5, %v3666_v38  ;;  %v1168_v8 = vpop.f32.mrb[18].mxu0  ;;  %v1418_v9 = vpack.c.bf16 %v1362_v2, %v1360_v1 }
 0x1a1   : > { %v1299_v10 = vmul.f32 0.02, %v2774_v4  ;;  %v2776_v11 = vadd.f32 %v1168_v8, %v3664_v37  ;;  %v1170_v12 = vpop.f32.mrb[19].mxu0 }
 0x1a2   : > { %v1300_v13 = vmul.f32 0.02, %v2775_v7  ;;  %v2777_v14 = vadd.f32 %v1170_v12, %v3666_v38  ;;  %1634 = vmatprep.mubr.bf16.mxu1 %v1418_v9 }
 0x1a3   : > { %v1301_v15 = vmul.f32 0.02, %v2776_v11  ;;  %1635 = vmatmul.mubr.bf16.gmra.mrb[28].mxu1 %v1417_v6  ;;  %v1363_v31 = vmax.f32 %v2774_v4, %v1299_v10 }
 0x1a4   : > { %v1302_v28 = vmul.f32 0.02, %v2777_v14  ;;  %v1364_v35 = vmax.f32 %v2775_v7, %v1300_v13 }
 0x1a5   : > { %v1365_v34 = vmax.f32 %v2776_v11, %v1301_v15 }
 0x1a6   : > { %v1366_v36 = vmax.f32 %v2777_v14, %v1302_v28  ;;  %v1174_v39 = vpop.f32.mrb[20].mxu0 }
 0x1a7   : > { %v2778_v40 = vadd.f32 %v1174_v39, %v3664_v37  ;;  %v1176_v41 = vpop.f32.mrb[21].mxu0  ;;  %v1419_v42 = vpack.c.bf16 %v1365_v34, %v1363_v31 }
 0x1a8   : > { %v2779_v43 = vadd.f32 %v1176_v41, %v3666_v38  ;;  %v1178_v44 = vpop.f32.mrb[22].mxu0  ;;  %v1420_v45 = vpack.c.bf16 %v1366_v36, %v1364_v35 }
 0x1a9   : > { %v1303_v46 = vmul.f32 0.02, %v2778_v40  ;;  %v2780_v47 = vadd.f32 %v1178_v44, %v3664_v37  ;;  %v1180_v48 = vpop.f32.mrb[23].mxu0 }
 0x1aa   : > { %v1304_v49 = vmul.f32 0.02, %v2779_v43  ;;  %v2781_v50 = vadd.f32 %v1180_v48, %v3666_v38  ;;  %1642 = vmatprep.mubr.bf16.mxu1 %v1420_v45 }
 0x1ab   : > { %v1305_v51 = vmul.f32 0.02, %v2780_v47  ;;  %1643 = vmatmul.mubr.bf16.gmra.mrb[32].mxu1 %v1419_v42  ;;  %v1367_v53 = vmax.f32 %v2778_v40, %v1303_v46 }
 0x1ac   : > { %v1306_v52 = vmul.f32 0.02, %v2781_v50  ;;  %v1368_v55 = vmax.f32 %v2779_v43, %v1304_v49 }
 0x1ad   : > { %v1369_v54 = vmax.f32 %v2780_v47, %v1305_v51 }
 0x1ae   : > { %v1370_v56 = vmax.f32 %v2781_v50, %v1306_v52  ;;  %v1184_v57 = vpop.f32.mrb[24].mxu0 }
 0x1af   : > { %v2782_v58 = vadd.f32 %v1184_v57, %v3664_v37  ;;  %v1186_v59 = vpop.f32.mrb[25].mxu0  ;;  %v1421_v60 = vpack.c.bf16 %v1369_v54, %v1367_v53 }
 0x1b0   : > { %v2783_v61 = vadd.f32 %v1186_v59, %v3666_v38  ;;  %v1188_v62 = vpop.f32.mrb[26].mxu0  ;;  %v1422_v63 = vpack.c.bf16 %v1370_v56, %v1368_v55 }
 0x1b1   : > { %v1307_v0 = vmul.f32 0.02, %v2782_v58  ;;  %v2784_v1 = vadd.f32 %v1188_v62, %v3664_v37  ;;  %v1190_v2 = vpop.f32.mrb[27].mxu0 }
 0x1b2   : > { %v1308_v3 = vmul.f32 0.02, %v2783_v61  ;;  %v2785_v4 = vadd.f32 %v1190_v2, %v3666_v38  ;;  %1650 = vmatprep.mubr.bf16.mxu1 %v1422_v63 }
 0x1b3   : > { %v1309_v5 = vmul.f32 0.02, %v2784_v1  ;;  %1651 = vmatmul.mubr.bf16.gmra.mrb[36].mxu1 %v1421_v60  ;;  %v1371_v7 = vmax.f32 %v2782_v58, %v1307_v0 }
 0x1b4   : > { %v1310_v6 = vmul.f32 0.02, %v2785_v4  ;;  %v1372_v9 = vmax.f32 %v2783_v61, %v1308_v3 }
 0x1b5   : > { %v1373_v8 = vmax.f32 %v2784_v1, %v1309_v5 }
 0x1b6   : > { %v1374_v10 = vmax.f32 %v2785_v4, %v1310_v6  ;;  %v1194_v11 = vpop.f32.mrb[28].mxu0 }
 0x1b7   : > { %v2786_v12 = vadd.f32 %v1194_v11, %v3664_v37  ;;  %v1196_v13 = vpop.f32.mrb[29].mxu0  ;;  %v1423_v14 = vpack.c.bf16 %v1373_v8, %v1371_v7 }
 0x1b8   : > { %v2787_v15 = vadd.f32 %v1196_v13, %v3666_v38  ;;  %v1198_v28 = vpop.f32.mrb[30].mxu0  ;;  %v1424_v31 = vpack.c.bf16 %v1374_v10, %v1372_v9 }
 0x1b9   : > { %v1311_v34 = vmul.f32 0.02, %v2786_v12  ;;  %v2788_v35 = vadd.f32 %v1198_v28, %v3664_v37  ;;  %v1200_v36 = vpop.f32.mrb[31].mxu0 }
 0x1ba   : > { %v1312_v39 = vmul.f32 0.02, %v2787_v15  ;;  %v2789_v40 = vadd.f32 %v1200_v36, %v3666_v38  ;;  %1658 = vmatprep.mubr.bf16.mxu1 %v1424_v31 }
 0x1bb   : > { %v1313_v41 = vmul.f32 0.02, %v2788_v35  ;;  %1659 = vmatmul.mubr.bf16.gmra.mrb[40].mxu1 %v1423_v14  ;;  %v1375_v43 = vmax.f32 %v2786_v12, %v1311_v34 }
 0x1bc   : > { %v1314_v42 = vmul.f32 0.02, %v2789_v40  ;;  %v1376_v45 = vmax.f32 %v2787_v15, %v1312_v39 }
 0x1bd   : > { %v1377_v44 = vmax.f32 %v2788_v35, %v1313_v41 }
 0x1be   : > { %v1378_v46 = vmax.f32 %v2789_v40, %v1314_v42  ;;  %v1204_v47 = vpop.f32.mrb[32].mxu0 }
 0x1bf   : > { %v2790_v48 = vadd.f32 %v1204_v47, %v3664_v37  ;;  %v1206_v49 = vpop.f32.mrb[33].mxu0  ;;  %v1425_v50 = vpack.c.bf16 %v1377_v44, %v1375_v43 }
 0x1c0   : > { %v2791_v51 = vadd.f32 %v1206_v49, %v3666_v38  ;;  %v1208_v52 = vpop.f32.mrb[34].mxu0  ;;  %v1426_v53 = vpack.c.bf16 %v1378_v46, %v1376_v45 }
 0x1c1   : > { %v1315_v54 = vmul.f32 0.02, %v2790_v48  ;;  %v2792_v55 = vadd.f32 %v1208_v52, %v3664_v37  ;;  %v1210_v56 = vpop.f32.mrb[35].mxu0 }
 0x1c2   : > { %v1316_v57 = vmul.f32 0.02, %v2791_v51  ;;  %v2793_v58 = vadd.f32 %v1210_v56, %v3666_v38  ;;  %1666 = vmatprep.mubr.bf16.mxu1 %v1426_v53 }
 0x1c3   : > { %v1317_v59 = vmul.f32 0.02, %v2792_v55  ;;  %1667 = vmatmul.mubr.bf16.gmra.mrb[44].mxu1 %v1425_v50  ;;  %v1379_v61 = vmax.f32 %v2790_v48, %v1315_v54 }
 0x1c4   : > { %v1318_v60 = vmul.f32 0.02, %v2793_v58  ;;  %v1380_v63 = vmax.f32 %v2791_v51, %v1316_v57 }
 0x1c5   : > { %v1381_v62 = vmax.f32 %v2792_v55, %v1317_v59 }
 0x1c6   : > { %v1382_v0 = vmax.f32 %v2793_v58, %v1318_v60  ;;  %v1214_v1 = vpop.f32.mrb[36].mxu0 }
 0x1c7   : > { %v2794_v2 = vadd.f32 %v1214_v1, %v3664_v37  ;;  %v1216_v3 = vpop.f32.mrb[37].mxu0  ;;  %v1427_v4 = vpack.c.bf16 %v1381_v62, %v1379_v61 }
 0x1c8   : > { %v2795_v5 = vadd.f32 %v1216_v3, %v3666_v38  ;;  %v1218_v6 = vpop.f32.mrb[38].mxu0  ;;  %v1428_v7 = vpack.c.bf16 %v1382_v0, %v1380_v63 }
 0x1c9   : > { %v1319_v8 = vmul.f32 0.02, %v2794_v2  ;;  %v2796_v9 = vadd.f32 %v1218_v6, %v3664_v37  ;;  %v1220_v10 = vpop.f32.mrb[39].mxu0  ;;  %v1054_v6 = vadd.f32 %v3631_v17, %v3666_v38 }
 0x1ca   : > { %v1320_v11 = vmul.f32 0.02, %v2795_v5  ;;  %v2797_v12 = vadd.f32 %v1220_v10, %v3666_v38  ;;  %1674 = vmatprep.mubr.bf16.mxu1 %v1428_v7 }
 0x1cb   : > { %v1321_v13 = vmul.f32 0.02, %v2796_v9  ;;  %1675 = vmatmul.mubr.bf16.gmra.mrb[48].mxu1 %v1427_v4  ;;  %v1383_v15 = vmax.f32 %v2794_v2, %v1319_v8  ;;  %v1052_v4 = vadd.f32 %v3629_v16, %v3664_v37 }
 0x1cc   : > { %v1322_v14 = vmul.f32 0.02, %v2797_v12  ;;  %v1384_v31 = vmax.f32 %v2795_v5, %v1320_v11 }
 0x1cd   : > { %v1385_v28 = vmax.f32 %v2796_v9, %v1321_v13 }
 0x1ce   : > { %v1386_v34 = vmax.f32 %v2797_v12, %v1322_v14  ;;  %v1224_v35 = vpop.f32.mrb[40].mxu0  ;;  %v1056_v12 = vadd.f32 %v3633_v18, %v3664_v37 }
 0x1cf   : > { %v2798_v36 = vadd.f32 %v1224_v35, %v3664_v37  ;;  %v1226_v39 = vpop.f32.mrb[41].mxu0  ;;  %v1429_v40 = vpack.c.bf16 %v1385_v28, %v1383_v15  ;;  %v1058_v28 = vadd.f32 %v3635_v19, %v3666_v38  ;;  %v1064_v19 = vadd.f32 %v3639_v21, %v3666_v38 }
 0x1d0   : > { %v2799_v41 = vadd.f32 %v1226_v39, %v3666_v38  ;;  %v1228_v42 = vpop.f32.mrb[42].mxu0  ;;  %v1430_v43 = vpack.c.bf16 %v1386_v34, %v1384_v31  ;;  %v1068_v21 = vadd.f32 %v3643_v23, %v3666_v38 }
 0x1d1   : > { %v1323_v44 = vmul.f32 0.02, %v2798_v36  ;;  %v2800_v45 = vadd.f32 %v1228_v42, %v3664_v37  ;;  %v1230_v46 = vpop.f32.mrb[43].mxu0  ;;  %v1062_v42 = vadd.f32 %v3637_v20, %v3664_v37 }
 0x1d2   : > { %v1324_v47 = vmul.f32 0.02, %v2799_v41  ;;  %v2801_v48 = vadd.f32 %v1230_v46, %v3666_v38  ;;  %1682 = vmatprep.mubr.bf16.mxu1 %v1430_v43 }
 0x1d3   : > { %v1325_v49 = vmul.f32 0.02, %v2800_v45  ;;  %1683 = vmatmul.mubr.bf16.gmra.mrb[52].mxu1 %v1429_v40  ;;  %v1387_v51 = vmax.f32 %v2798_v36, %v1323_v44 }
 0x1d4   : > { %v1326_v50 = vmul.f32 0.02, %v2801_v48  ;;  %v1388_v53 = vmax.f32 %v2799_v41, %v1324_v47  ;;  %v3090_v41 = vld [vmem:[%s4057_s5 + $0x20] sm:$0xff]  }
 0x1d5   : > { %v1389_v52 = vmax.f32 %v2800_v45, %v1325_v49  ;;  %2686 = vmatprep.subr.bf16.mxu1 %v3090_v41  ;;  %v3091_v49 = vld [vmem:[%s4057_s5 + $0x28] sm:$0xff]  }
 0x1d6   : > { %v1390_v54 = vmax.f32 %v2801_v48, %v1326_v50  ;;  %v1234_v55 = vpop.f32.mrb[44].mxu0  ;;  %2687 = vmatpush3.bf16.msra.mxu1 %v3090_v41  ;;  %v1066_v50 = vadd.f32 %v3641_v22, %v3664_v37  ;;  %v3092_v22 = vld [vmem:[%s4057_s5 + $0x30] sm:$0xff]  }
 0x1d7   : > { %v2802_v56 = vadd.f32 %v1234_v55, %v3664_v37  ;;  %v1236_v57 = vpop.f32.mrb[45].mxu0  ;;  %v1431_v58 = vpack.c.bf16 %v1389_v52, %v1387_v51  ;;  %2688 = vmatprep.subr.bf16.mxu1 %v3091_v49 }
 0x1d8   : > { %v2803_v59 = vadd.f32 %v1236_v57, %v3666_v38  ;;  %v1238_v60 = vpop.f32.mrb[46].mxu0  ;;  %v1432_v61 = vpack.c.bf16 %v1390_v54, %v1388_v53 }
 0x1d9   : > { %v1327_v62 = vmul.f32 0.02, %v2802_v56  ;;  %v2804_v63 = vadd.f32 %v1238_v60, %v3664_v37  ;;  %v1240_v0 = vpop.f32.mrb[47].mxu0 }
 0x1da   : > { %v1328_v1 = vmul.f32 0.02, %v2803_v59  ;;  %v2805_v2 = vadd.f32 %v1240_v0, %v3666_v38  ;;  %1690 = vmatprep.mubr.bf16.mxu1 %v1432_v61  ;;  %2689 = vmatpush3.bf16.msra.mxu1 %v3091_v49 }
 0x1db   : > { %v1329_v3 = vmul.f32 0.02, %v2804_v63  ;;  %1691 = vmatmul.mubr.bf16.gmra.mrb[56].mxu1 %v1431_v58  ;;  %v1391_v7 = vmax.f32 %v2802_v56, %v1327_v62  ;;  %v1072_v62 = vadd.f32 %v3645_v24, %v3664_v37  ;;  %2690 = vmatprep.subr.bf16.mxu1 %v3092_v22 }
 0x1dc   : > { %v1330_v5 = vmul.f32 0.02, %v2805_v2  ;;  %v1392_v9 = vmax.f32 %v2803_v59, %v1328_v1 }
 0x1dd   : > { %v1393_v8 = vmax.f32 %v2804_v63, %v1329_v3  ;;  %v1074_v63 = vadd.f32 %v3647_v25, %v3666_v38  ;;  %v1078_v25 = vadd.f32 %v3651_v27, %v3666_v38  ;;  %v1084_v27 = vadd.f32 %v3655_v30, %v3666_v38 }
 0x1de   : > { %v1394_v10 = vmax.f32 %v2805_v2, %v1330_v5  ;;  %v1244_v11 = vpop.f32.mrb[48].mxu0  ;;  %2691 = vmatpush3.bf16.msra.mxu1 %v3092_v22  ;;  %v3093_v5 = vld [vmem:[%s4057_s5 + $0x38] sm:$0xff]  }
 0x1df   : > { %v1245_v13 = vadd.f32 %v1244_v11, %v1052_v4  ;;  %v1246_v14 = vpop.f32.mrb[49].mxu0  ;;  %v1433_v15 = vpack.c.bf16 %v1393_v8, %v1391_v7  ;;  %2692 = vmatprep.subr.bf16.mxu1 %v3093_v5 }
 0x1e0   : > { %v1247_v16 = vadd.f32 %v1246_v14, %v1054_v6  ;;  %v1248_v31 = vpop.f32.mrb[50].mxu0  ;;  %v1434_v34 = vpack.c.bf16 %v1394_v10, %v1392_v9  ;;  %v1076_v6 = vadd.f32 %v3649_v26, %v3664_v37  ;;  %v1082_v26 = vadd.f32 %v3653_v29, %v3664_v37 }
 0x1e1   : > { %v1331_v35 = vmul.f32 0.02, %v1245_v13  ;;  %v1249_v36 = vadd.f32 %v1248_v31, %v1056_v12  ;;  %v1250_v17 = vpop.f32.mrb[51].mxu0 }
 0x1e2   : > { %v1332_v39 = vmul.f32 0.02, %v1247_v16  ;;  %v1251_v40 = vadd.f32 %v1250_v17, %v1058_v28  ;;  %1698 = vmatprep.mubr.bf16.mxu1 %v1434_v34  ;;  %2693 = vmatpush3.bf16.msra.mxu1 %v3093_v5 }
 0x1e3   : > { %v1333_v18 = vmul.f32 0.02, %v1249_v36  ;;  %1699 = vmatmul.mubr.bf16.gmra.mrb[60].mxu1 %v1433_v15  ;;  %v1395_v44 = vmax.f32 %v1245_v13, %v1331_v35 }
 0x1e4   : > { %v1334_v43 = vmul.f32 0.02, %v1251_v40  ;;  %v1396_v46 = vmax.f32 %v1247_v16, %v1332_v39 }
 0x1e5   : > { %v1397_v45 = vmax.f32 %v1249_v36, %v1333_v18 }
 0x1e6   : > { %v1398_v47 = vmax.f32 %v1251_v40, %v1334_v43  ;;  %v1254_v48 = vpop.f32.mrb[52].mxu0  ;;  %v1086_v40 = vadd.f32 %v3657_v32, %v3664_v37  ;;  %v1088_v43 = vadd.f32 %v3659_v33, %v3666_v38  ;;  %v3775_v38 = vld [vmem:[%s4056_s4] ss:$0 sm:$0xff] }
 0x1e7   : > { %v1255_v20 = vadd.f32 %v1254_v48, %v1062_v42  ;;  %v1256_v51 = vpop.f32.mrb[53].mxu0  ;;  %v1435_v52 = vpack.c.bf16 %v1397_v45, %v1395_v44 }
 0x1e8   : > { %v1257_v53 = vadd.f32 %v1256_v51, %v1064_v19  ;;  %v1258_v54 = vpop.f32.mrb[54].mxu0  ;;  %v1436_v55 = vpack.c.bf16 %v1398_v47, %v1396_v46 }
 0x1e9   : > { %v1335_v56 = vmul.f32 0.02, %v1255_v20  ;;  %v1259_v57 = vadd.f32 %v1258_v54, %v1066_v50  ;;  %v1260_v58 = vpop.f32.mrb[55].mxu0 }
 0x1ea   : > { %v1336_v59 = vmul.f32 0.02, %v1257_v53  ;;  %v1261_v60 = vadd.f32 %v1260_v58, %v1068_v21  ;;  %1706 = vmatprep.mubr.bf16.mxu1 %v1436_v55 }
 0x1eb   : > { %v1337_v61 = vmul.f32 0.02, %v1259_v57  ;;  %1707 = vmatmul.mubr.bf16.gmra.mrb[64].mxu1 %v1435_v52  ;;  %v1399_v0 = vmax.f32 %v1255_v20, %v1335_v56 }
 0x1ec   : > { %v1338_v23 = vmul.f32 0.02, %v1261_v60  ;;  %v1400_v2 = vmax.f32 %v1257_v53, %v1336_v59 }
 0x1ed   : > { %v1401_v1 = vmax.f32 %v1259_v57, %v1337_v61 }
 0x1ee   : > { %v1402_v3 = vmax.f32 %v1261_v60, %v1338_v23  ;;  %v1264_v4 = vpop.f32.mrb[56].mxu0 }
 0x1ef   : > { %v1265_v24 = vadd.f32 %v1264_v4, %v1072_v62  ;;  %v1266_v7 = vpop.f32.mrb[57].mxu0  ;;  %v1437_v8 = vpack.c.bf16 %v1401_v1, %v1399_v0 }
 0x1f0   : > { %v1267_v9 = vadd.f32 %v1266_v7, %v1074_v63  ;;  %v1268_v10 = vpop.f32.mrb[58].mxu0  ;;  %v1438_v11 = vpack.c.bf16 %v1402_v3, %v1400_v2 }
 0x1f1   : > { %v1339_v12 = vmul.f32 0.02, %v1265_v24  ;;  %v1269_v13 = vadd.f32 %v1268_v10, %v1076_v6  ;;  %v1270_v14 = vpop.f32.mrb[59].mxu0 }
 0x1f2   : > { %v1340_v15 = vmul.f32 0.02, %v1267_v9  ;;  %v1271_v28 = vadd.f32 %v1270_v14, %v1078_v25  ;;  %1714 = vmatprep.mubr.bf16.mxu1 %v1438_v11 }
 0x1f3   : > { %v1341_v16 = vmul.f32 0.02, %v1269_v13  ;;  %1715 = vmatmul.mubr.bf16.gmra.mrb[68].mxu1 %v1437_v8  ;;  %v1403_v34 = vmax.f32 %v1265_v24, %v1339_v12 }
 0x1f4   : > { %v1342_v31 = vmul.f32 0.02, %v1271_v28  ;;  %v1404_v36 = vmax.f32 %v1267_v9, %v1340_v15 }
 0x1f5   : > { %v1405_v35 = vmax.f32 %v1269_v13, %v1341_v16 }
 0x1f6   : > { %v1406_v17 = vmax.f32 %v1271_v28, %v1342_v31  ;;  %v1274_v39 = vpop.f32.mrb[60].mxu0 }
 0x1f7   : > { %v1275_v41 = vadd.f32 %v1274_v39, %v1082_v26  ;;  %v1276_v18 = vpop.f32.mrb[61].mxu0  ;;  %v1439_v42 = vpack.c.bf16 %v1405_v35, %v1403_v34 }
 0x1f8   : > { %v1277_v29 = vadd.f32 %v1276_v18, %v1084_v27  ;;  %v1278_v19 = vpop.f32.mrb[62].mxu0  ;;  %v1440_v44 = vpack.c.bf16 %v1406_v17, %v1404_v36 }
 0x1f9   : > { %v1343_v45 = vmul.f32 0.02, %v1275_v41  ;;  %v1279_v46 = vadd.f32 %v1278_v19, %v1086_v40  ;;  %v1280_v30 = vpop.f32.mrb[63].mxu0 }
 0x1fa   : > { %v1344_v47 = vmul.f32 0.02, %v1277_v29  ;;  %v1281_v48 = vadd.f32 %v1280_v30, %v1088_v43  ;;  %1722 = vmatprep.mubr.bf16.mxu1 %v1440_v44 }
 0x1fb   : > { %v1345_v49 = vmul.f32 0.02, %v1279_v46  ;;  %1723 = vmatmul.mubr.bf16.gmra.mrb[72].mxu1 %v1439_v42  ;;  %v1407_v20 = vmax.f32 %v1275_v41, %v1343_v45 }
 0x1fc   : > { %v1346_v50 = vmul.f32 0.02, %v1281_v48  ;;  %v1408_v37 = vmax.f32 %v1277_v29, %v1344_v47 }
 0x1fd   : > { %v1409_v32 = vmax.f32 %v1279_v46, %v1345_v49 }
 0x1fe   : > { %v1410_v51 = vmax.f32 %v1281_v48, %v1346_v50 }
 0x1ff   : > { %v1441_v52 = vpack.c.bf16 %v1409_v32, %v1407_v20 }
 0x200   : > { %v1442_v21 = vpack.c.bf16 %v1410_v51, %v1408_v37 }
 0x202   : > { %1730 = vmatprep.mubr.bf16.mxu1 %v1442_v21 }
 0x203   : > { %1731 = vmatmul.mubr.bf16.gmra.mrb[76].mxu1 %v1441_v52 }
 0x25e   : > { %v2558_v33 = vpop.f32.mrb[16].mxu1 }
 0x25f   : > { %v2559_v53 = vpop.f32.mrb[17].mxu1 }
 0x260   : > { %v2560_v54 = vadd.f32 %v2559_v53, %v2558_v33  ;;  %v2561_v55 = vpop.f32.mrb[18].mxu1 }
 0x261   : > { %v2562_v56 = vpop.f32.mrb[19].mxu1 }
 0x262   : > { %v1613_v57 = vadd.f32 %v2560_v54, %v3775_v38  ;;  %v2563_v58 = vadd.f32 %v2562_v56, %v2561_v55 }
 0x264   : > { %v1739_v59 = vmul.f32 0.02, %v1613_v57  ;;  %v1616_v60 = vadd.f32 %v2563_v58, %v3775_v38 }
 0x266   : > { %v1740_v22 = vmul.f32 0.02, %v1616_v60  ;;  %v2564_v61 = vpop.f32.mrb[20].mxu1  ;;  %v1771_v23 = vmax.f32 %v1613_v57, %v1739_v59 }
 0x267   : > { %v2565_v62 = vpop.f32.mrb[21].mxu1 }
 0x268   : > { %v1772_v63 = vmax.f32 %v1616_v60, %v1740_v22  ;;  %v2566_v0 = vadd.f32 %v2565_v62, %v2564_v61  ;;  %v2567_v1 = vpop.f32.mrb[22].mxu1 }
 0x269   : > { %v2568_v2 = vpop.f32.mrb[23].mxu1 }
 0x26a   : > { %v1621_v3 = vadd.f32 %v2566_v0, %v3775_v38  ;;  %v2569_v4 = vadd.f32 %v2568_v2, %v2567_v1  ;;  %v1803_v5 = vpack.c.bf16 %v1772_v63, %v1771_v23 }
 0x26c   : > { %v1741_v6 = vmul.f32 0.02, %v1621_v3  ;;  %v1624_v24 = vadd.f32 %v2569_v4, %v3775_v38  ;;  %2694 = vmatprep.mubr.bf16.mxu1 %v1803_v5 }
 0x26e   : > { %v1742_v7 = vmul.f32 0.02, %v1624_v24  ;;  %v2570_v8 = vpop.f32.mrb[24].mxu1  ;;  %v1773_v9 = vmax.f32 %v1621_v3, %v1741_v6 }
 0x26f   : > { %v2571_v25 = vpop.f32.mrb[25].mxu1 }
 0x270   : > { %v1774_v10 = vmax.f32 %v1624_v24, %v1742_v7  ;;  %v2572_v11 = vadd.f32 %v2571_v25, %v2570_v8  ;;  %v2573_v12 = vpop.f32.mrb[26].mxu1 }
 0x271   : > { %v2574_v13 = vpop.f32.mrb[27].mxu1 }
 0x272   : > { %v1804_v14 = vpack.c.bf16 %v1774_v10, %v1773_v9  ;;  %v1629_v15 = vadd.f32 %v2572_v11, %v3775_v38  ;;  %v2575_v28 = vadd.f32 %v2574_v13, %v2573_v12 }
 0x274   : > { %v1743_v16 = vmul.f32 0.02, %v1629_v15  ;;  %v1632_v26 = vadd.f32 %v2575_v28, %v3775_v38  ;;  %2695 = vmatmul.mubr.bf16.vlgmr.msra.gmra.mrb[80].mxu1 %v1804_v14 }
 0x276   : > { %v1744_v31 = vmul.f32 0.02, %v1632_v26  ;;  %v2576_v27 = vpop.f32.mrb[28].mxu1  ;;  %v1775_v35 = vmax.f32 %v1629_v15, %v1743_v16 }
 0x277   : > { %v2577_v34 = vpop.f32.mrb[29].mxu1 }
 0x278   : > { %v1776_v36 = vmax.f32 %v1632_v26, %v1744_v31  ;;  %v2578_v17 = vadd.f32 %v2577_v34, %v2576_v27  ;;  %v2579_v39 = vpop.f32.mrb[30].mxu1 }
 0x279   : > { %v2580_v40 = vpop.f32.mrb[31].mxu1 }
 0x27a   : > { %v1637_v41 = vadd.f32 %v2578_v17, %v3775_v38  ;;  %v2581_v18 = vadd.f32 %v2580_v40, %v2579_v39  ;;  %v1805_v42 = vpack.c.bf16 %v1776_v36, %v1775_v35 }
 0x27c   : > { %v1745_v43 = vmul.f32 0.02, %v1637_v41  ;;  %v1640_v29 = vadd.f32 %v2581_v18, %v3775_v38  ;;  %2698 = vmatprep.mubr.bf16.mxu1 %v1805_v42 }
 0x27e   : > { %v1746_v19 = vmul.f32 0.02, %v1640_v29  ;;  %v2582_v44 = vpop.f32.mrb[32].mxu1  ;;  %v1777_v46 = vmax.f32 %v1637_v41, %v1745_v43 }
 0x27f   : > { %v2583_v45 = vpop.f32.mrb[33].mxu1 }
 0x280   : > { %v1778_v30 = vmax.f32 %v1640_v29, %v1746_v19  ;;  %v2584_v47 = vadd.f32 %v2583_v45, %v2582_v44  ;;  %v2585_v48 = vpop.f32.mrb[34].mxu1 }
 0x281   : > { %v2586_v49 = vpop.f32.mrb[35].mxu1 }
 0x282   : > { %v1645_v50 = vadd.f32 %v2584_v47, %v3775_v38  ;;  %v2587_v20 = vadd.f32 %v2586_v49, %v2585_v48  ;;  %v1806_v32 = vpack.c.bf16 %v1778_v30, %v1777_v46 }
 0x284   : > { %v1747_v37 = vmul.f32 0.02, %v1645_v50  ;;  %v1648_v51 = vadd.f32 %v2587_v20, %v3775_v38  ;;  %2699 = vmatmul.mubr.bf16.gmra.mrb[84].mxu1 %v1806_v32 }
 0x286   : > { %v1748_v52 = vmul.f32 0.02, %v1648_v51  ;;  %v2588_v21 = vpop.f32.mrb[36].mxu1  ;;  %v1779_v53 = vmax.f32 %v1645_v50, %v1747_v37 }
 0x287   : > { %v2589_v33 = vpop.f32.mrb[37].mxu1 }
 0x288   : > { %v1780_v54 = vmax.f32 %v1648_v51, %v1748_v52  ;;  %v2590_v55 = vadd.f32 %v2589_v33, %v2588_v21  ;;  %v2591_v56 = vpop.f32.mrb[38].mxu1 }
 0x289   : > { %v2592_v57 = vpop.f32.mrb[39].mxu1 }
 0x28a   : > { %v1653_v58 = vadd.f32 %v2590_v55, %v3775_v38  ;;  %v2593_v59 = vadd.f32 %v2592_v57, %v2591_v56  ;;  %v1807_v60 = vpack.c.bf16 %v1780_v54, %v1779_v53 }
 0x28c   : > { %v1749_v22 = vmul.f32 0.02, %v1653_v58  ;;  %v1656_v61 = vadd.f32 %v2593_v59, %v3775_v38  ;;  %2702 = vmatprep.mubr.bf16.mxu1 %v1807_v60 }
 0x28e   : > { %v1750_v62 = vmul.f32 0.02, %v1656_v61  ;;  %v2594_v23 = vpop.f32.mrb[40].mxu1  ;;  %v1781_v0 = vmax.f32 %v1653_v58, %v1749_v22 }
 0x28f   : > { %v2595_v63 = vpop.f32.mrb[41].mxu1 }
 0x290   : > { %v1782_v1 = vmax.f32 %v1656_v61, %v1750_v62  ;;  %v2596_v2 = vadd.f32 %v2595_v63, %v2594_v23  ;;  %v2597_v3 = vpop.f32.mrb[42].mxu1 }
 0x291   : > { %v2598_v4 = vpop.f32.mrb[43].mxu1 }
 0x292   : > { %v1661_v5 = vadd.f32 %v2596_v2, %v3775_v38  ;;  %v2599_v6 = vadd.f32 %v2598_v4, %v2597_v3  ;;  %v1808_v24 = vpack.c.bf16 %v1782_v1, %v1781_v0 }
 0x294   : > { %v1751_v7 = vmul.f32 0.02, %v1661_v5  ;;  %v1664_v8 = vadd.f32 %v2599_v6, %v3775_v38  ;;  %2703 = vmatmul.mubr.bf16.gmra.mrb[88].mxu1 %v1808_v24 }
 0x296   : > { %v1752_v25 = vmul.f32 0.02, %v1664_v8  ;;  %v2600_v9 = vpop.f32.mrb[44].mxu1  ;;  %v1783_v11 = vmax.f32 %v1661_v5, %v1751_v7 }
 0x297   : > { %v2601_v10 = vpop.f32.mrb[45].mxu1 }
 0x298   : > { %v1784_v12 = vmax.f32 %v1664_v8, %v1752_v25  ;;  %v2602_v13 = vadd.f32 %v2601_v10, %v2600_v9  ;;  %v2603_v14 = vpop.f32.mrb[46].mxu1 }
 0x299   : > { %v2604_v15 = vpop.f32.mrb[47].mxu1 }
 0x29a   : > { %v1669_v28 = vadd.f32 %v2602_v13, %v3775_v38  ;;  %v2605_v16 = vadd.f32 %v2604_v15, %v2603_v14  ;;  %v1809_v26 = vpack.c.bf16 %v1784_v12, %v1783_v11 }
 0x29c   : > { %v1753_v31 = vmul.f32 0.02, %v1669_v28  ;;  %v1672_v27 = vadd.f32 %v2605_v16, %v3775_v38  ;;  %2706 = vmatprep.mubr.bf16.mxu1 %v1809_v26 }
 0x29e   : > { %v1754_v34 = vmul.f32 0.02, %v1672_v27  ;;  %v2606_v35 = vpop.f32.mrb[48].mxu1  ;;  %v1785_v17 = vmax.f32 %v1669_v28, %v1753_v31 }
 0x29f   : > { %v2607_v36 = vpop.f32.mrb[49].mxu1 }
 0x2a0   : > { %v1786_v39 = vmax.f32 %v1672_v27, %v1754_v34  ;;  %v2608_v40 = vadd.f32 %v2607_v36, %v2606_v35  ;;  %v2609_v41 = vpop.f32.mrb[50].mxu1 }
 0x2a1   : > { %v2610_v18 = vpop.f32.mrb[51].mxu1 }
 0x2a2   : > { %v1677_v42 = vadd.f32 %v2608_v40, %v3775_v38  ;;  %v2611_v43 = vadd.f32 %v2610_v18, %v2609_v41  ;;  %v1810_v29 = vpack.c.bf16 %v1786_v39, %v1785_v17 }
 0x2a4   : > { %v1755_v19 = vmul.f32 0.02, %v1677_v42  ;;  %v1680_v44 = vadd.f32 %v2611_v43, %v3775_v38  ;;  %2707 = vmatmul.mubr.bf16.gmra.mrb[92].mxu1 %v1810_v29 }
 0x2a6   : > { %v1756_v45 = vmul.f32 0.02, %v1680_v44  ;;  %v2612_v46 = vpop.f32.mrb[52].mxu1  ;;  %v1787_v47 = vmax.f32 %v1677_v42, %v1755_v19 }
 0x2a7   : > { %v2613_v30 = vpop.f32.mrb[53].mxu1 }
 0x2a8   : > { %v1788_v48 = vmax.f32 %v1680_v44, %v1756_v45  ;;  %v2614_v49 = vadd.f32 %v2613_v30, %v2612_v46  ;;  %v2615_v50 = vpop.f32.mrb[54].mxu1 }
 0x2a9   : > { %v2616_v20 = vpop.f32.mrb[55].mxu1 }
 0x2aa   : > { %v1685_v32 = vadd.f32 %v2614_v49, %v3775_v38  ;;  %v2617_v37 = vadd.f32 %v2616_v20, %v2615_v50  ;;  %v1811_v51 = vpack.c.bf16 %v1788_v48, %v1787_v47 }
 0x2ac   : > { %v1757_v52 = vmul.f32 0.02, %v1685_v32  ;;  %v1688_v21 = vadd.f32 %v2617_v37, %v3775_v38  ;;  %2710 = vmatprep.mubr.bf16.mxu1 %v1811_v51 }
 0x2ae   : > { %v1758_v33 = vmul.f32 0.02, %v1688_v21  ;;  %v2618_v53 = vpop.f32.mrb[56].mxu1  ;;  %v1789_v55 = vmax.f32 %v1685_v32, %v1757_v52 }
 0x2af   : > { %v2619_v54 = vpop.f32.mrb[57].mxu1 }
 0x2b0   : > { %v1790_v56 = vmax.f32 %v1688_v21, %v1758_v33  ;;  %v2620_v57 = vadd.f32 %v2619_v54, %v2618_v53  ;;  %v2621_v58 = vpop.f32.mrb[58].mxu1 }
 0x2b1   : > { %v2622_v59 = vpop.f32.mrb[59].mxu1 }
 0x2b2   : > { %v1693_v60 = vadd.f32 %v2620_v57, %v3775_v38  ;;  %v2623_v22 = vadd.f32 %v2622_v59, %v2621_v58  ;;  %v1812_v61 = vpack.c.bf16 %v1790_v56, %v1789_v55 }
 0x2b4   : > { %v1759_v62 = vmul.f32 0.02, %v1693_v60  ;;  %v1696_v23 = vadd.f32 %v2623_v22, %v3775_v38  ;;  %2711 = vmatmul.mubr.bf16.gmra.mrb[96].mxu1 %v1812_v61 }
 0x2b6   : > { %v1760_v63 = vmul.f32 0.02, %v1696_v23  ;;  %v2624_v0 = vpop.f32.mrb[60].mxu1  ;;  %v1791_v2 = vmax.f32 %v1693_v60, %v1759_v62 }
 0x2b7   : > { %v2625_v1 = vpop.f32.mrb[61].mxu1 }
 0x2b8   : > { %v1792_v3 = vmax.f32 %v1696_v23, %v1760_v63  ;;  %v2626_v4 = vadd.f32 %v2625_v1, %v2624_v0  ;;  %v2627_v5 = vpop.f32.mrb[62].mxu1 }
 0x2b9   : > { %v2628_v6 = vpop.f32.mrb[63].mxu1 }
 0x2ba   : > { %v1701_v24 = vadd.f32 %v2626_v4, %v3775_v38  ;;  %v2629_v7 = vadd.f32 %v2628_v6, %v2627_v5  ;;  %v1813_v8 = vpack.c.bf16 %v1792_v3, %v1791_v2  ;;  %v3813_v5 = vld [vmem:[%s4058_s6] ss:$0 sm:$0xff] }
 0x2bc   : > { %v1761_v25 = vmul.f32 0.02, %v1701_v24  ;;  %v1704_v9 = vadd.f32 %v2629_v7, %v3775_v38  ;;  %2714 = vmatprep.mubr.bf16.mxu1 %v1813_v8 }
 0x2be   : > { %v1762_v10 = vmul.f32 0.02, %v1704_v9  ;;  %v2630_v11 = vpop.f32.mrb[64].mxu1  ;;  %v1793_v13 = vmax.f32 %v1701_v24, %v1761_v25 }
 0x2bf   : > { %v2631_v12 = vpop.f32.mrb[65].mxu1 }
 0x2c0   : > { %v1794_v14 = vmax.f32 %v1704_v9, %v1762_v10  ;;  %v2632_v15 = vadd.f32 %v2631_v12, %v2630_v11  ;;  %v2633_v28 = vpop.f32.mrb[66].mxu1 }
 0x2c1   : > { %v2634_v16 = vpop.f32.mrb[67].mxu1 }
 0x2c2   : > { %v1709_v26 = vadd.f32 %v2632_v15, %v3775_v38  ;;  %v2635_v31 = vadd.f32 %v2634_v16, %v2633_v28  ;;  %v1814_v27 = vpack.c.bf16 %v1794_v14, %v1793_v13 }
 0x2c4   : > { %v1763_v34 = vmul.f32 0.02, %v1709_v26  ;;  %v1712_v35 = vadd.f32 %v2635_v31, %v3775_v38  ;;  %2715 = vmatmul.mubr.bf16.gmra.mrb[100].mxu1 %v1814_v27 }
 0x2c6   : > { %v1764_v36 = vmul.f32 0.02, %v1712_v35  ;;  %v2636_v17 = vpop.f32.mrb[68].mxu1  ;;  %v1795_v40 = vmax.f32 %v1709_v26, %v1763_v34 }
 0x2c7   : > { %v2637_v39 = vpop.f32.mrb[69].mxu1 }
 0x2c8   : > { %v1796_v41 = vmax.f32 %v1712_v35, %v1764_v36  ;;  %v2638_v18 = vadd.f32 %v2637_v39, %v2636_v17  ;;  %v2639_v42 = vpop.f32.mrb[70].mxu1 }
 0x2c9   : > { %v2640_v43 = vpop.f32.mrb[71].mxu1 }
 0x2ca   : > { %v1717_v29 = vadd.f32 %v2638_v18, %v3775_v38  ;;  %v2641_v19 = vadd.f32 %v2640_v43, %v2639_v42  ;;  %v1815_v44 = vpack.c.bf16 %v1796_v41, %v1795_v40 }
 0x2cc   : > { %v1765_v45 = vmul.f32 0.02, %v1717_v29  ;;  %v1720_v46 = vadd.f32 %v2641_v19, %v3775_v38  ;;  %2718 = vmatprep.mubr.bf16.mxu1 %v1815_v44 }
 0x2ce   : > { %v1766_v30 = vmul.f32 0.02, %v1720_v46  ;;  %v2642_v47 = vpop.f32.mrb[72].mxu1  ;;  %v1797_v49 = vmax.f32 %v1717_v29, %v1765_v45 }
 0x2cf   : > { %v2643_v48 = vpop.f32.mrb[73].mxu1 }
 0x2d0   : > { %v1798_v50 = vmax.f32 %v1720_v46, %v1766_v30  ;;  %v2644_v20 = vadd.f32 %v2643_v48, %v2642_v47  ;;  %v2645_v32 = vpop.f32.mrb[74].mxu1 }
 0x2d1   : > { %v2646_v37 = vpop.f32.mrb[75].mxu1 }
 0x2d2   : > { %v1725_v51 = vadd.f32 %v2644_v20, %v3775_v38  ;;  %v2647_v52 = vadd.f32 %v2646_v37, %v2645_v32  ;;  %v1816_v21 = vpack.c.bf16 %v1798_v50, %v1797_v49 }
 0x2d4   : > { %v1767_v33 = vmul.f32 0.02, %v1725_v51  ;;  %v1728_v53 = vadd.f32 %v2647_v52, %v3775_v38  ;;  %2719 = vmatmul.mubr.bf16.gmra.mrb[104].mxu1 %v1816_v21 }
 0x2d6   : > { %v1768_v54 = vmul.f32 0.02, %v1728_v53  ;;  %v2648_v55 = vpop.f32.mrb[76].mxu1  ;;  %v1799_v57 = vmax.f32 %v1725_v51, %v1767_v33 }
 0x2d7   : > { %v2649_v56 = vpop.f32.mrb[77].mxu1 }
 0x2d8   : > { %v1800_v58 = vmax.f32 %v1728_v53, %v1768_v54  ;;  %v2650_v59 = vadd.f32 %v2649_v56, %v2648_v55  ;;  %v2651_v60 = vpop.f32.mrb[78].mxu1 }
 0x2d9   : > { %v2652_v22 = vpop.f32.mrb[79].mxu1 }
 0x2da   : > { %v1733_v61 = vadd.f32 %v2650_v59, %v3775_v38  ;;  %v2653_v62 = vadd.f32 %v2652_v22, %v2651_v60  ;;  %v1817_v23 = vpack.c.bf16 %v1800_v58, %v1799_v57 }
 0x2dc   : > { %v1769_v63 = vmul.f32 0.02, %v1733_v61  ;;  %v1736_v0 = vadd.f32 %v2653_v62, %v3775_v38  ;;  %2722 = vmatprep.mubr.bf16.mxu1 %v1817_v23 }
 0x2de   : > { %v1770_v1 = vmul.f32 0.02, %v1736_v0  ;;  %v1801_v2 = vmax.f32 %v1733_v61, %v1769_v63 }
 0x2e0   : > { %v1802_v3 = vmax.f32 %v1736_v0, %v1770_v1 }
 0x2e2   : > { %v1818_v4 = vpack.c.bf16 %v1802_v3, %v1801_v2 }
 0x2e4   : > { %2723 = vmatmul.mubr.bf16.gmra.mrb[108].mxu1 %v1818_v4 }
 0x347   : > { %v2696_v6 = vpop.f32.mrb[80].mxu1 }
 0x348   : > { %v1933_v24 = vadd.f32 %v2696_v6, %v3813_v5  ;;  %v1924_v7 = vpop.f32.mrb[81].mxu1 }
 0x349   : > { %v1925_v38 = vadd.f32 %v3813_v5, %v1924_v7  ;;  %v2697_v8 = vpop.f32.mrb[82].mxu1 }
 0x34a   : > { %2054 = vst.msk [vmem:[%s3817_s15 + $0x10] sm:$0xff] %vm2051_vm0, %v1933_v24  ;;  %v1936_v25 = vadd.f32 %v2697_v8, %v3813_v5  ;;  %v1927_v9 = vpop.f32.mrb[83].mxu1 }
 0x34b   : > { %2052 = vst.msk [vmem:[%s3817_s15] sm:$0xff] %vm2051_vm0, %v1925_v38  ;;  %v1928_v10 = vadd.f32 %v3813_v5, %v1927_v9 }
 0x34c   : > { %2055 = vst.msk [vmem:[%s3817_s15 + $0x18] sm:$0xff] %vm2051_vm0, %v1936_v25 }
 0x34d   : > { %2053 = vst.msk [vmem:[%s3817_s15 + $0x8] sm:$0xff] %vm2051_vm0, %v1928_v10 }
 0x357   : > { %v2700_v11 = vpop.f32.mrb[84].mxu1 }
 0x358   : > { %v1949_v12 = vadd.f32 %v2700_v11, %v3813_v5  ;;  %v1940_v13 = vpop.f32.mrb[85].mxu1 }
 0x359   : > { %v1941_v14 = vadd.f32 %v3813_v5, %v1940_v13  ;;  %v2701_v15 = vpop.f32.mrb[86].mxu1 }
 0x35a   : > { %2058 = vst.msk [vmem:[%s3817_s15 + $0x30] sm:$0xff] %vm2051_vm0, %v1949_v12  ;;  %v1952_v28 = vadd.f32 %v2701_v15, %v3813_v5  ;;  %v1943_v16 = vpop.f32.mrb[87].mxu1 }
 0x35b   : > { %2056 = vst.msk [vmem:[%s3817_s15 + $0x20] sm:$0xff] %vm2051_vm0, %v1941_v14  ;;  %v1944_v26 = vadd.f32 %v3813_v5, %v1943_v16 }
 0x35c   : > { %2059 = vst.msk [vmem:[%s3817_s15 + $0x38] sm:$0xff] %vm2051_vm0, %v1952_v28 }
 0x35d   : > { %2057 = vst.msk [vmem:[%s3817_s15 + $0x28] sm:$0xff] %vm2051_vm0, %v1944_v26 }
 0x367   : > { %v2704_v31 = vpop.f32.mrb[88].mxu1 }
 0x368   : > { %v1965_v27 = vadd.f32 %v2704_v31, %v3813_v5  ;;  %v1956_v34 = vpop.f32.mrb[89].mxu1 }
 0x369   : > { %v1957_v35 = vadd.f32 %v3813_v5, %v1956_v34  ;;  %v2705_v36 = vpop.f32.mrb[90].mxu1 }
 0x36a   : > { %2062 = vst.msk [vmem:[%s3817_s15 + $0x50] sm:$0xff] %vm2051_vm0, %v1965_v27  ;;  %v1968_v17 = vadd.f32 %v2705_v36, %v3813_v5  ;;  %v1959_v39 = vpop.f32.mrb[91].mxu1 }
 0x36b   : > { %2060 = vst.msk [vmem:[%s3817_s15 + $0x40] sm:$0xff] %vm2051_vm0, %v1957_v35  ;;  %v1960_v40 = vadd.f32 %v3813_v5, %v1959_v39 }
 0x36c   : > { %2063 = vst.msk [vmem:[%s3817_s15 + $0x58] sm:$0xff] %vm2051_vm0, %v1968_v17 }
 0x36d   : > { %2061 = vst.msk [vmem:[%s3817_s15 + $0x48] sm:$0xff] %vm2051_vm0, %v1960_v40 }
 0x377   : > { %v2708_v41 = vpop.f32.mrb[92].mxu1 }
 0x378   : > { %v1981_v18 = vadd.f32 %v2708_v41, %v3813_v5  ;;  %v1972_v42 = vpop.f32.mrb[93].mxu1 }
 0x379   : > { %v1973_v43 = vadd.f32 %v3813_v5, %v1972_v42  ;;  %v2709_v29 = vpop.f32.mrb[94].mxu1 }
 0x37a   : > { %2066 = vst.msk [vmem:[%s3817_s15 + $0x70] sm:$0xff] %vm2051_vm0, %v1981_v18  ;;  %v1984_v19 = vadd.f32 %v2709_v29, %v3813_v5  ;;  %v1975_v44 = vpop.f32.mrb[95].mxu1 }
 0x37b   : > { %2064 = vst.msk [vmem:[%s3817_s15 + $0x60] sm:$0xff] %vm2051_vm0, %v1973_v43  ;;  %v1976_v45 = vadd.f32 %v3813_v5, %v1975_v44 }
 0x37c   : > { %2067 = vst.msk [vmem:[%s3817_s15 + $0x78] sm:$0xff] %vm2051_vm0, %v1984_v19 }
 0x37d   : > { %2065 = vst.msk [vmem:[%s3817_s15 + $0x68] sm:$0xff] %vm2051_vm0, %v1976_v45 }
 0x387   : > { %v2712_v46 = vpop.f32.mrb[96].mxu1 }
 0x388   : > { %v1997_v30 = vadd.f32 %v2712_v46, %v3813_v5  ;;  %v1988_v47 = vpop.f32.mrb[97].mxu1 }
 0x389   : > { %v1989_v48 = vadd.f32 %v3813_v5, %v1988_v47  ;;  %v2713_v49 = vpop.f32.mrb[98].mxu1 }
 0x38a   : > { %2070 = vst.msk [vmem:[%s3817_s15 + $0x90] sm:$0xff] %vm2051_vm0, %v1997_v30  ;;  %v2000_v50 = vadd.f32 %v2713_v49, %v3813_v5  ;;  %v1991_v20 = vpop.f32.mrb[99].mxu1 }
 0x38b   : > { %2068 = vst.msk [vmem:[%s3817_s15 + $0x80] sm:$0xff] %vm2051_vm0, %v1989_v48  ;;  %v1992_v32 = vadd.f32 %v3813_v5, %v1991_v20 }
 0x38c   : > { %2071 = vst.msk [vmem:[%s3817_s15 + $0x98] sm:$0xff] %vm2051_vm0, %v2000_v50 }
 0x38d   : > { %2069 = vst.msk [vmem:[%s3817_s15 + $0x88] sm:$0xff] %vm2051_vm0, %v1992_v32 }
 0x397   : > { %v2716_v37 = vpop.f32.mrb[100].mxu1 }
 0x398   : > { %v2013_v51 = vadd.f32 %v2716_v37, %v3813_v5  ;;  %v2004_v52 = vpop.f32.mrb[101].mxu1 }
 0x399   : > { %v2005_v21 = vadd.f32 %v3813_v5, %v2004_v52  ;;  %v2717_v33 = vpop.f32.mrb[102].mxu1 }
 0x39a   : > { %2074 = vst.msk [vmem:[%s3817_s15 + $0xb0] sm:$0xff] %vm2051_vm0, %v2013_v51  ;;  %v2016_v53 = vadd.f32 %v2717_v33, %v3813_v5  ;;  %v2007_v54 = vpop.f32.mrb[103].mxu1 }
 0x39b   : > { %2072 = vst.msk [vmem:[%s3817_s15 + $0xa0] sm:$0xff] %vm2051_vm0, %v2005_v21  ;;  %v2008_v55 = vadd.f32 %v3813_v5, %v2007_v54 }
 0x39c   : > { %2075 = vst.msk [vmem:[%s3817_s15 + $0xb8] sm:$0xff] %vm2051_vm0, %v2016_v53 }
 0x39d   : > { %2073 = vst.msk [vmem:[%s3817_s15 + $0xa8] sm:$0xff] %vm2051_vm0, %v2008_v55 }
 0x3a7   : > { %v2720_v56 = vpop.f32.mrb[104].mxu1 }
 0x3a8   : > { %v2029_v57 = vadd.f32 %v2720_v56, %v3813_v5  ;;  %v2020_v58 = vpop.f32.mrb[105].mxu1 }
 0x3a9   : > { %v2021_v59 = vadd.f32 %v3813_v5, %v2020_v58  ;;  %v2721_v60 = vpop.f32.mrb[106].mxu1 }
 0x3aa   : > { %2078 = vst.msk [vmem:[%s3817_s15 + $0xd0] sm:$0xff] %vm2051_vm0, %v2029_v57  ;;  %v2032_v22 = vadd.f32 %v2721_v60, %v3813_v5  ;;  %v2023_v61 = vpop.f32.mrb[107].mxu1 }
 0x3ab   : > { %2076 = vst.msk [vmem:[%s3817_s15 + $0xc0] sm:$0xff] %vm2051_vm0, %v2021_v59  ;;  %v2024_v62 = vadd.f32 %v3813_v5, %v2023_v61 }
 0x3ac   : > { %2079 = vst.msk [vmem:[%s3817_s15 + $0xd8] sm:$0xff] %vm2051_vm0, %v2032_v22 }
 0x3ad   : > { %2077 = vst.msk [vmem:[%s3817_s15 + $0xc8] sm:$0xff] %vm2051_vm0, %v2024_v62 }
 0x3b7   : > { %v2724_v23 = vpop.f32.mrb[108].mxu1  ;;  %2090 = sbr.rel (!%p3247_p4) target bundleno = 1014 (0x3f6), region = 52 }
 0x3b8   : > { %v2045_v63 = vadd.f32 %v2724_v23, %v3813_v5  ;;  %v2036_v0 = vpop.f32.mrb[109].mxu1 }
 0x3b9   : > { %v2037_v1 = vadd.f32 %v3813_v5, %v2036_v0  ;;  %v2725_v2 = vpop.f32.mrb[110].mxu1 }
 0x3ba   : > { %2082 = vst.msk [vmem:[%s3817_s15 + $0xf0] sm:$0xff] %vm2051_vm0, %v2045_v63  ;;  %v2048_v3 = vadd.f32 %v2725_v2, %v3813_v5  ;;  %v2039_v4 = vpop.f32.mrb[111].mxu1 }
 0x3bb   : > { %2080 = vst.msk [vmem:[%s3817_s15 + $0xe0] sm:$0xff] %vm2051_vm0, %v2037_v1  ;;  %v2040_v6 = vadd.f32 %v3813_v5, %v2039_v4 }
 0x3bc   : > { %2083 = vst.msk [vmem:[%s3817_s15 + $0xf8] sm:$0xff] %vm2051_vm0, %v2048_v3 }
 0x3bd   : > { %2081 = vst.msk [vmem:[%s3817_s15 + $0xe8] sm:$0xff] %vm2051_vm0, %v2040_v6 }
 0x3be   : > { %s4070_s24 = smov (!%p2093_p8, %s2092_s24), 32 }
 0x3bf   : > { %s2523_s22 = sshll.u32 %s4070_s24, 7 }
 0x3c0   : > { %p2526_p9 = scmp.eq.s32.totalorder %s2523_s22, 0 }
 0x3c1   : > { %s3926_s23 = sshrl.u32 (!%p2526_p9), %s4070_s24, 5 }
 0x3c2   : > { %2101 = sbr.rel (%p2526_p9) target bundleno = 1014 (0x3f6), region = 56  ;;  %p2527_p10 = scmp.le.s32.totalorder (!%p2526_p9), %s3926_s23, 0 }
 0x3c9   : > { %2379 = sbr.rel (%p2527_p10) target bundleno = 993 (0x3e1), region = 132  ;;  %s4061_s27 = smov (!%p2527_p10), %s3920_s19 }
 0x3ca   : > { %s4062_s9 = smov (!%p2527_p10), %s3817_s15  ;;  %s3935_s20 = smov (!%p2527_p10), 0  }
 0x3cb   : > { %s3937_s26 = smov (!%p2527_p10), 0  }
 0x3d0 LB: >> { %v2225_v5 = vld [vmem:[%s3156_s9] sm:$0xff]  ;;  %v2227_v24 = vld [vmem:[%s3156_s9 + $0x8] sm:$0xff]  ;;  %v2229_v7 = vld [vmem:[%s3156_s9 + $0x10] sm:$0xff]  ;;  %s2289_s21 = sadd.s32 1, %s3160_s20  ;;  %s2219_s26 = sadd.s32 1, %s3164_s26   ;;  %s3164_s26 = sphi %s3937_s26, %s2219_s26   ;;  %s3160_s20 = sphi %s3935_s20, %s4065_s20   ;;  %s3156_s9 = sphi %s4062_s9, %s4064_s9   ;;  %s3152_s27 = sphi %s4061_s27, %s4063_s27  }
 0x3d1   : >> { %2226 = vst [vmem:[%s3152_s27] sm:$0xff] %v2225_v5  ;;  %2228 = vst [vmem:[%s3152_s27 + $0x8] sm:$0xff] %v2227_v24  ;;  %v2231_v38 = vld [vmem:[%s3156_s9 + $0x18] sm:$0xff]  ;;  %v2233_v8 = vld [vmem:[%s3156_s9 + $0x20] sm:$0xff]  ;;  %p2290_p11 = scmp.ge.s32.totalorder %s2289_s21, %s3926_s23  ;;  %p2218_p12 = scmp.ge.s32.totalorder %s2219_s26, %s3926_s23 }
 0x3d2   : >> { %2230 = vst [vmem:[%s3152_s27 + $0x10] sm:$0xff] %v2229_v7  ;;  %v2235_v25 = vld [vmem:[%s3156_s9 + $0x28] sm:$0xff]  ;;  %2232 = vst [vmem:[%s3152_s27 + $0x18] sm:$0xff] %v2231_v38  ;;  %v2237_v9 = vld [vmem:[%s3156_s9 + $0x30] sm:$0xff] }
 0x3d3   : >> { %2234 = vst [vmem:[%s3152_s27 + $0x20] sm:$0xff] %v2233_v8  ;;  %2236 = vst [vmem:[%s3152_s27 + $0x28] sm:$0xff] %v2235_v25  ;;  %v2239_v10 = vld [vmem:[%s3156_s9 + $0x38] sm:$0xff]  ;;  %v2241_v11 = vld [vmem:[%s3156_s9 + $0x40] sm:$0xff]  ;;  %s4072_s21 = smov (%p2290_p11, %s2289_s21), 0 }
 0x3d4   : >> { %2238 = vst [vmem:[%s3152_s27 + $0x30] sm:$0xff] %v2237_v9  ;;  %2240 = vst [vmem:[%s3152_s27 + $0x38] sm:$0xff] %v2239_v10  ;;  %v2243_v12 = vld [vmem:[%s3156_s9 + $0x48] sm:$0xff]  ;;  %v2245_v13 = vld [vmem:[%s3156_s9 + $0x50] sm:$0xff]  ;;  %s2528_s29 = sshll.u32 %s4072_s21, 8  ;;  %s4065_s20 = smov %s4072_s21 }
 0x3d5   : >> { %2242 = vst [vmem:[%s3152_s27 + $0x40] sm:$0xff] %v2241_v11  ;;  %v2247_v14 = vld [vmem:[%s3156_s9 + $0x58] sm:$0xff]  ;;  %2244 = vst [vmem:[%s3152_s27 + $0x48] sm:$0xff] %v2243_v12  ;;  %v2249_v15 = vld [vmem:[%s3156_s9 + $0x60] sm:$0xff]  ;;  %s3993_s30 = scalar_lea.vmem %s3817_s15, %s2528_s29 [#allocation2]   ;;  %s2295_s10 = scalar_lea.vmem %s3920_s19, %s2528_s29  }
 0x3d6   : >> { %2246 = vst [vmem:[%s3152_s27 + $0x50] sm:$0xff] %v2245_v13  ;;  %2248 = vst [vmem:[%s3152_s27 + $0x58] sm:$0xff] %v2247_v14  ;;  %v2251_v28 = vld [vmem:[%s3156_s9 + $0x68] sm:$0xff]  ;;  %v2253_v16 = vld [vmem:[%s3156_s9 + $0x70] sm:$0xff] }
 0x3d7   : >> { %2250 = vst [vmem:[%s3152_s27 + $0x60] sm:$0xff] %v2249_v15  ;;  %2252 = vst [vmem:[%s3152_s27 + $0x68] sm:$0xff] %v2251_v28  ;;  %v2255_v26 = vld [vmem:[%s3156_s9 + $0x78] sm:$0xff]  ;;  %v2257_v31 = vld [vmem:[%s3156_s9 + $0x80] sm:$0xff] }
 0x3d8   : >> { %2254 = vst [vmem:[%s3152_s27 + $0x70] sm:$0xff] %v2253_v16  ;;  %v2259_v27 = vld [vmem:[%s3156_s9 + $0x88] sm:$0xff]  ;;  %2256 = vst [vmem:[%s3152_s27 + $0x78] sm:$0xff] %v2255_v26  ;;  %v2261_v34 = vld [vmem:[%s3156_s9 + $0x90] sm:$0xff] }
 0x3d9   : >> { %2258 = vst [vmem:[%s3152_s27 + $0x80] sm:$0xff] %v2257_v31  ;;  %2260 = vst [vmem:[%s3152_s27 + $0x88] sm:$0xff] %v2259_v27  ;;  %v2263_v35 = vld [vmem:[%s3156_s9 + $0x98] sm:$0xff]  ;;  %v2265_v36 = vld [vmem:[%s3156_s9 + $0xa0] sm:$0xff] }
 0x3da   : >> { %2262 = vst [vmem:[%s3152_s27 + $0x90] sm:$0xff] %v2261_v34  ;;  %2264 = vst [vmem:[%s3152_s27 + $0x98] sm:$0xff] %v2263_v35  ;;  %v2267_v17 = vld [vmem:[%s3156_s9 + $0xa8] sm:$0xff]  ;;  %v2269_v39 = vld [vmem:[%s3156_s9 + $0xb0] sm:$0xff]  ;;  %2221 = sbr.rel (!%p2218_p12) target bundleno = 976 (0x3d0), region = 138 }
 0x3db   : >> { %2266 = vst [vmem:[%s3152_s27 + $0xa0] sm:$0xff] %v2265_v36  ;;  %v2271_v40 = vld [vmem:[%s3156_s9 + $0xb8] sm:$0xff]  ;;  %2268 = vst [vmem:[%s3152_s27 + $0xa8] sm:$0xff] %v2267_v17  ;;  %v2273_v41 = vld [vmem:[%s3156_s9 + $0xc0] sm:$0xff] }
 0x3dc   : >> { %2270 = vst [vmem:[%s3152_s27 + $0xb0] sm:$0xff] %v2269_v39  ;;  %2272 = vst [vmem:[%s3152_s27 + $0xb8] sm:$0xff] %v2271_v40  ;;  %v2275_v18 = vld [vmem:[%s3156_s9 + $0xc8] sm:$0xff]  ;;  %v2277_v42 = vld [vmem:[%s3156_s9 + $0xd0] sm:$0xff] }
 0x3dd   : >> { %2274 = vst [vmem:[%s3152_s27 + $0xc0] sm:$0xff] %v2273_v41  ;;  %2276 = vst [vmem:[%s3152_s27 + $0xc8] sm:$0xff] %v2275_v18  ;;  %v2279_v43 = vld [vmem:[%s3156_s9 + $0xd8] sm:$0xff]  ;;  %v2281_v29 = vld [vmem:[%s3156_s9 + $0xe0] sm:$0xff] }
 0x3de   : >> { %2278 = vst [vmem:[%s3152_s27 + $0xd0] sm:$0xff] %v2277_v42  ;;  %v2283_v19 = vld [vmem:[%s3156_s9 + $0xe8] sm:$0xff]  ;;  %2280 = vst [vmem:[%s3152_s27 + $0xd8] sm:$0xff] %v2279_v43  ;;  %v2285_v44 = vld [vmem:[%s3156_s9 + $0xf0] sm:$0xff] }
 0x3df   : >> { %2282 = vst [vmem:[%s3152_s27 + $0xe0] sm:$0xff] %v2281_v29  ;;  %2284 = vst [vmem:[%s3152_s27 + $0xe8] sm:$0xff] %v2283_v19  ;;  %v2287_v45 = vld [vmem:[%s3156_s9 + $0xf8] sm:$0xff]  ;;  %s4064_s9 = smov %s3993_s30 }
 0x3e0   : >> { %2286 = vst [vmem:[%s3152_s27 + $0xf0] sm:$0xff] %v2285_v44  ;;  %2288 = vst [vmem:[%s3152_s27 + $0xf8] sm:$0xff] %v2287_v45  ;;  %s4063_s27 = smov %s2295_s10 }
 0x3e1 PF: > { %s4034_s11 = sand.u32 31, %s4070_s24   ;;  %s2540_s12 = sshll.u32 %s3926_s23, 8 }
 0x3e2   : > { %s2300_s13 = scalar_lea.vmem %s3817_s15, %s2540_s12 [#allocation2]   ;;  %s2302_s14 = scalar_lea.vmem %s3920_s19, %s2540_s12  }
 0x3e3   : > { %p2533_p13 = scmp.le.s32.totalorder %s4034_s11, 0 }
 0x3e4   : > { %s3166_s16 = smov (!%p2533_p13), %s2302_s14   ;;  %s3170_s17 = smov (!%p2533_p13), %s2300_s13  }
 0x3e5   : > { %2393 = sbr.rel (%p2533_p13) target bundleno = 1014 (0x3f6), region = 143  ;;  %s3174_s18 = smov (!%p2533_p13), 0  }
 0x3e6   : > { %s3178_s22 = smov (!%p2533_p13), 0  }
 0x3ec LB: >> { %v2312_v46 = vld [vmem:[%s3172_s17] sm:$0xff]  ;;  %s2314_s24 = sadd.s32 1, %s3176_s18  ;;  %s2306_s22 = sadd.s32 1, %s3180_s22   ;;  %s3180_s22 = sphi %s3178_s22, %s2306_s22   ;;  %s3176_s18 = sphi %s3174_s18, %s3175_s18   ;;  %s3172_s17 = sphi %s3170_s17, %s2319_s17   ;;  %s3168_s16 = sphi %s3166_s16, %s2320_s16  }
 0x3ed   : >> { %2313 = vst [vmem:[%s3168_s16] sm:$0xff] %v2312_v46  ;;  %p2315_p0 = scmp.ge.s32.totalorder %s2314_s24, %s4034_s11  ;;  %p2305_p1 = scmp.ge.s32.totalorder %s2306_s22, %s4034_s11 }
 0x3ef   : >> { %s4074_s24 = smov (%p2315_p0, %s2314_s24), 0  ;;  %2308 = sbr.rel (!%p2305_p1) target bundleno = 1004 (0x3ec), region = 149 }
 0x3f0   : >> { %s2534_s15 = sshll.u32 %s4074_s24, 3  ;;  %s3175_s18 = smov %s4074_s24  }
 0x3f1   : >> { %s2319_s17 = scalar_lea.vmem %s2300_s13, %s2534_s15 [#allocation2]   ;;  %s2320_s16 = scalar_lea.vmem %s2302_s14, %s2534_s15  }
 0x3f6 PF: > { %p14_p2 = scmp.ge.s32.totalorder %s3237_s28, 4   ;;  %s4066_s24 = smov %s3144_s25 }
 0x3f7   : > { %s4067_s25 = smov %s3245_s8  ;;  %s4068_s26 = smov %s3237_s28 }
 0x3f8   :  { %16 = sbr.rel (!%p14_p2) target bundleno = 2 (0x2), region = 160 }

</bundles_post_ra>
